<compile_context>
chip_gen: v5e
topology: v5e:2x2
jax: 0.10.0
libtpu: 0.0.40
codegen_flags: <defaults>
</compile_context>

<pallas_src>
import functools

import numpy as np
import jax
import jax.numpy as jnp
from jax.experimental import pallas as pl
from jax.experimental.pallas import tpu as pltpu


def _row_lstm_kernel(x_ref, wcat_ref, bias_ref, sr_ref, sl_ref, h_out_ref):
    """Refs:
      x_ref:     (Hh, C, B*W)        image, batch folded onto lanes
      wcat_ref:  (4H, 2C + 3H)       fused [wi_t0|wi_t1|ws_t0|ws_t1|ws_t2]
      bias_ref:  (4H, 1)             combined conv biases
      sr_ref:    (B*W, B*W)          v @ sr == "take w-1, zero at w==0 / batch edge"
      sl_ref:    (B*W, B*W)          v @ sl == "take w+1, zero at w==W-1 / batch edge"
      h_out_ref: (Hh, H, B*W)        per-row hidden state (lane-dense stores)
    """
    Hh, C, BW = x_ref.shape
    Hd = h_out_ref.shape[1]

    wcat = wcat_ref[...]                                        # (4H, 2C+3H), tiny
    bias = jnp.broadcast_to(bias_ref[...], (4 * Hd, BW))        # hoisted broadcast

    def body(r, carry):
        c_prev, h_prev = carry
        x = x_ref[r]                                            # (C, BW)
        sr = sr_ref[...]                                        # load-in-loop: spill-friendly
        sl = sl_ref[...]

        # Width shifts + zero padding + batch-boundary masking, all as MXU matmuls
        # (the MXU is idle here; keeps the recurrent loop free of roll/iota/where).
        x_l = jnp.dot(x, sr, preferred_element_type=jnp.float32)       # x[w-1]
        h_l = jnp.dot(h_prev, sr, preferred_element_type=jnp.float32)  # h[w-1]
        h_r = jnp.dot(h_prev, sl, preferred_element_type=jnp.float32)  # h[w+1]

        # Fused masked-input-conv + state-conv: one matmul per row.
        rhs = jnp.concatenate([x_l, x, h_l, h_prev, h_r], axis=0)      # (2C+3H, BW)
        gates = jax.nn.sigmoid(
            jnp.dot(wcat, rhs, preferred_element_type=jnp.float32) + bias)  # (4H, BW)

        # Sublane-aligned gate splits (Hd is a multiple of 8).
        ig = gates[0 * Hd:1 * Hd]
        gg = gates[1 * Hd:2 * Hd]
        fg = gates[2 * Hd:3 * Hd]
        og = gates[3 * Hd:4 * Hd]

        c = fg * c_prev + ig * gg
        h = og * jnp.tanh(c)

        h_out_ref[r] = h                                        # (Hd, BW) full-vreg store
        return (c, h)

    init = (jnp.zeros((Hd, BW), jnp.float32),
            jnp.zeros((Hd, BW), jnp.float32))
    jax.lax.fori_loop(0, Hh, body, init, unroll=True)


def row_lstm_forward(x, params, hidden_dim):
    """x: (B, C, Hh, W) float32 (NCHW, like the PyTorch module)."""
    B, C, Hh, W = x.shape
    Hd = int(hidden_dim)
    # The module applies conv_i_s (in=hidden) to x and conv_s_s (in=in_channels) to h,
    # which only type-checks when in_channels == hidden_dim. Fail loudly otherwise.
    assert C == Hd, "RowLSTM requires in_channels == hidden_dim"
    BW = B * W

    wi = params["wi"].astype(jnp.float32)           # (4H, C, 3)  MaskedConv1d('B')
    ws = params["ws"].astype(jnp.float32)           # (4H, H, 3)  conv_s_s
    # MaskedConv1d('B', k=3) zeroes tap 2 -> drop it; fuse both convs into one matmul.
    wcat = jnp.concatenate(
        [wi[:, :, 0], wi[:, :, 1], ws[:, :, 0], ws[:, :, 1], ws[:, :, 2]], axis=1)
    bias = (params["bi"] + params["bs"]).astype(jnp.float32).reshape(4 * Hd, 1)

    # Constant shift matrices: fold the k=3 conv's spatial shift, its zero padding
    # and the batch-fold boundary masking into right-multiplications.
    lane = jnp.arange(BW)
    row = lane[:, None]          # input lane j
    col = lane[None, :]          # output lane l
    sr = ((row == col - 1) & (col % W != 0)).astype(jnp.float32)       # -> v[:, l-1]
    sl = ((row == col + 1) & (col % W != W - 1)).astype(jnp.float32)   # -> v[:, l+1]

    # (B, C, Hh, W) -> (Hh, C, B*W): fold batch onto the lane axis.
    x_packed = jnp.transpose(x, (2, 1, 0, 3)).reshape(Hh, C, BW)

    h_rows = pl.pallas_call(
        _row_lstm_kernel,
        out_shape=jax.ShapeDtypeStruct((Hh, Hd, BW), jnp.float32),
        in_specs=[pl.BlockSpec(memory_space=pltpu.MemorySpace.VMEM)] * 5,
        out_specs=pl.BlockSpec(memory_space=pltpu.MemorySpace.VMEM),
    )(x_packed, wcat, bias, sr, sl)

    # Undo the batch fold -> (B, Hh, Hd, W), then faithfully reproduce the module's
    #   output.view(B, H, W, hidden).permute(0, 3, 1, 2)
    # (a reinterpreting reshape of the channel-major (Hd, W) flattening).
    hall = h_rows.reshape(Hh, Hd, B, W).transpose(2, 0, 1, 3)          # (B, Hh, Hd, W)
    out = hall.reshape(B, Hh, W, Hd).transpose(0, 3, 1, 2)             # (B, Hd, Hh, W)

    # Residual 1x1 conv: no row-to-row dependence -> hoisted off the sequential kernel.
    res = jnp.einsum("oc,bchw->bohw",
                     params["wr"].reshape(Hd, C).astype(jnp.float32), x)
    res = res + params["br"].astype(jnp.float32)[None, :, None, None]
    return out + res


def row_lstm_reference(x, params, hidden_dim):
    """Pure-JAX reference matching the PyTorch forward."""
    B, C, Hh, W = x.shape
    Hd = hidden_dim
    wi = params["wi"].at[:, :, 2].set(0.0)
    ws, bi, bs = params["ws"], params["bi"], params["bs"]

    def conv1d(inp, w, b):  # inp (B, Cin, W), w (O, Cin, 3), pad=1
        xp = jnp.pad(inp, ((0, 0), (0, 0), (1, 1)))
        out = (jnp.einsum("oc,bcw->bow", w[:, :, 0], xp[:, :, :-2])
               + jnp.einsum("oc,bcw->bow", w[:, :, 1], xp[:, :, 1:-1])
               + jnp.einsum("oc,bcw->bow", w[:, :, 2], xp[:, :, 2:]))
        return out + b[None, :, None]

    c = jnp.zeros((B, Hd, W), jnp.float32)
    h = jnp.zeros((B, Hd, W), jnp.float32)
    rows = []
    for r in range(Hh):
        xin = x[:, :, r, :]
        gates = jax.nn.sigmoid(conv1d(h, ws, bs) + conv1d(xin, wi, bi))
        ig, gg, fg, og = (gates[:, 0:Hd], gates[:, Hd:2 * Hd],
                          gates[:, 2 * Hd:3 * Hd], gates[:, 3 * Hd:4 * Hd])
        c = fg * c + ig * gg
        h = og * jnp.tanh(c)
        rows.append(h)
    hall = jnp.stack(rows, axis=1)                                     # (B, Hh, Hd, W)
    out = hall.reshape(B, Hh, W, Hd).transpose(0, 3, 1, 2)
    res = jnp.einsum("oc,bchw->bohw", params["wr"].reshape(Hd, C), x) \
        + params["br"][None, :, None, None]
    return out + res


if __name__ == "__main__":
    # Shapes consistent with the module: width == image_size (hard-coded 32 for
    # cifar10), in_channels == hidden_dim.  B=4 makes the folded lane axis B*W=128
    # (lane-dense); hidden_dim=8 keeps the gate splits sublane-aligned.
    B, C, Hh, W = 4, 8, 8, 32
    Hd = C

    key = jax.random.PRNGKey(0)
    ks = jax.random.split(key, 7)
    params = {
        "wi": 0.1 * jax.random.normal(ks[0], (4 * Hd, C, 3), jnp.float32),   # conv_i_s
        "bi": 0.1 * jax.random.normal(ks[1], (4 * Hd,), jnp.float32),
        "ws": 0.1 * jax.random.normal(ks[2], (4 * Hd, Hd, 3), jnp.float32),  # conv_s_s
        "bs": 0.1 * jax.random.normal(ks[3], (4 * Hd,), jnp.float32),
        "wr": 0.1 * jax.random.normal(ks[4], (Hd, C, 1, 1), jnp.float32),    # residual 1x1
        "br": 0.1 * jax.random.normal(ks[5], (Hd,), jnp.float32),
    }
    x = jax.random.normal(ks[6], (B, C, Hh, W), jnp.float32)

    fwd = jax.jit(row_lstm_forward, static_argnums=(2,))
    out = jax.block_until_ready(fwd(x, params, Hd))
    ref = jax.block_until_ready(row_lstm_reference(x, params, Hd))

    assert out.shape == (B, Hd, Hh, W), out.shape
    np.testing.assert_allclose(np.asarray(out), np.asarray(ref), rtol=1e-2, atol=1e-2)
    print("KERNEL_OK")
</pallas_src>

<mosaic_0001>
module attributes {stable_mosaic.version = 11 : i64} {
  func.func @_row_lstm_kernel(%arg0: memref<8x8x128xf32, #tpu.memory_space<vmem>>, %arg1: memref<32x40xf32, #tpu.memory_space<vmem>>, %arg2: memref<32x1xf32, #tpu.memory_space<vmem>>, %arg3: memref<128x128xf32, #tpu.memory_space<vmem>>, %arg4: memref<128x128xf32, #tpu.memory_space<vmem>>, %arg5: memref<8x8x128xf32, #tpu.memory_space<vmem>>) attributes {dimension_semantics = [], scalar_prefetch = 0 : i64, scratch_operands = 0 : i64, tpu.core_type = #tpu.core_type<tc>} {
    %c0 = arith.constant 0 : index
    %c0_0 = arith.constant 0 : index
    %0 = vector.load %arg1[%c0, %c0_0] : memref<32x40xf32, #tpu.memory_space<vmem>>, vector<32x40xf32>
    %c0_1 = arith.constant 0 : index
    %c0_2 = arith.constant 0 : index
    %1 = vector.load %arg2[%c0_1, %c0_2] : memref<32x1xf32, #tpu.memory_space<vmem>>, vector<32x1xf32>
    %2 = vector.shape_cast %1 : vector<32x1xf32> to vector<32x1xf32>
    %3 = vector.broadcast %2 : vector<32x1xf32> to vector<32x128xf32>
    %cst = arith.constant 0.000000e+00 : f32
    %4 = vector.broadcast %cst : f32 to vector<8x128xf32>
    %cst_3 = arith.constant 0.000000e+00 : f32
    %5 = vector.broadcast %cst_3 : f32 to vector<8x128xf32>
    %c0_i32 = arith.constant 0 : i32
    %6 = arith.index_cast %c0_i32 : i32 to index
    %c0_4 = arith.constant 0 : index
    %c0_5 = arith.constant 0 : index
    %7 = vector.load %arg0[%6, %c0_4, %c0_5] : memref<8x8x128xf32, #tpu.memory_space<vmem>>, vector<1x8x128xf32>
    %8 = vector.shape_cast %7 : vector<1x8x128xf32> to vector<8x128xf32>
    %c0_6 = arith.constant 0 : index
    %c0_7 = arith.constant 0 : index
    %9 = vector.load %arg3[%c0_6, %c0_7] : memref<128x128xf32, #tpu.memory_space<vmem>>, vector<128x128xf32>
    %c0_8 = arith.constant 0 : index
    %c0_9 = arith.constant 0 : index
    %10 = vector.load %arg4[%c0_8, %c0_9] : memref<128x128xf32, #tpu.memory_space<vmem>>, vector<128x128xf32>
    %cst_10 = arith.constant dense<0.000000e+00> : vector<8x128xf32>
    %11 = tpu.matmul %8, %9, %cst_10 {dimension_numbers = #tpu.dot_dimension_numbers<[1], [0], [0], [1], [0, 0, 1, 1], [], []>} : vector<8x128xf32>, vector<128x128xf32>, vector<8x128xf32> -> vector<8x128xf32>
    %cst_11 = arith.constant dense<0.000000e+00> : vector<8x128xf32>
    %12 = tpu.matmul %5, %9, %cst_11 {dimension_numbers = #tpu.dot_dimension_numbers<[1], [0], [0], [1], [0, 0, 1, 1], [], []>} : vector<8x128xf32>, vector<128x128xf32>, vector<8x128xf32> -> vector<8x128xf32>
    %cst_12 = arith.constant dense<0.000000e+00> : vector<8x128xf32>
    %13 = tpu.matmul %5, %10, %cst_12 {dimension_numbers = #tpu.dot_dimension_numbers<[1], [0], [0], [1], [0, 0, 1, 1], [], []>} : vector<8x128xf32>, vector<128x128xf32>, vector<8x128xf32> -> vector<8x128xf32>
    %14 = tpu.concatenate %11, %8, %12, %5, %13 in 0 : vector<8x128xf32>, vector<8x128xf32>, vector<8x128xf32>, vector<8x128xf32>, vector<8x128xf32> -> vector<40x128xf32>
    %cst_13 = arith.constant dense<0.000000e+00> : vector<32x128xf32>
    %15 = tpu.matmul %0, %14, %cst_13 {dimension_numbers = #tpu.dot_dimension_numbers<[1], [0], [0], [1], [0, 0, 1, 1], [], []>} : vector<32x40xf32>, vector<40x128xf32>, vector<32x128xf32> -> vector<32x128xf32>
    %16 = arith.addf %15, %3 : vector<32x128xf32>
    %17 = arith.negf %16 : vector<32x128xf32>
    %18 = math.exp %17 : vector<32x128xf32>
    %cst_14 = arith.constant 1.000000e+00 : f32
    %19 = vector.broadcast %cst_14 : f32 to vector<32x128xf32>
    %20 = arith.addf %19, %18 : vector<32x128xf32>
    %21 = arith.divf %19, %20 : vector<32x128xf32>
    %22 = vector.extract_strided_slice %21 {offsets = [0, 0], sizes = [8, 128], strides = [1, 1]} : vector<32x128xf32> to vector<8x128xf32>
    %23 = vector.extract_strided_slice %21 {offsets = [8, 0], sizes = [8, 128], strides = [1, 1]} : vector<32x128xf32> to vector<8x128xf32>
    %24 = vector.extract_strided_slice %21 {offsets = [16, 0], sizes = [8, 128], strides = [1, 1]} : vector<32x128xf32> to vector<8x128xf32>
    %25 = vector.extract_strided_slice %21 {offsets = [24, 0], sizes = [8, 128], strides = [1, 1]} : vector<32x128xf32> to vector<8x128xf32>
    %26 = arith.mulf %24, %4 : vector<8x128xf32>
    %27 = arith.mulf %22, %23 : vector<8x128xf32>
    %28 = arith.addf %26, %27 : vector<8x128xf32>
    %29 = math.tanh %28 : vector<8x128xf32>
    %30 = arith.mulf %25, %29 : vector<8x128xf32>
    %31 = arith.index_cast %c0_i32 : i32 to index
    %c0_15 = arith.constant 0 : index
    %c0_16 = arith.constant 0 : index
    %32 = vector.load %arg5[%31, %c0_15, %c0_16] : memref<8x8x128xf32, #tpu.memory_space<vmem>>, vector<1x8x128xf32>
    %33 = vector.shape_cast %32 : vector<1x8x128xf32> to vector<8x128xf32>
    %34 = vector.shape_cast %30 : vector<8x128xf32> to vector<1x8x128xf32>
    tpu.vector_store %arg5[%31, %c0_15, %c0_16], %34 {strides = array<i32>} : memref<8x8x128xf32, #tpu.memory_space<vmem>>, vector<1x8x128xf32>,
    %c1_i32 = arith.constant 1 : i32
    %35 = arith.index_cast %c1_i32 : i32 to index
    %c0_17 = arith.constant 0 : index
    %c0_18 = arith.constant 0 : index
    %36 = vector.load %arg0[%35, %c0_17, %c0_18] : memref<8x8x128xf32, #tpu.memory_space<vmem>>, vector<1x8x128xf32>
    %37 = vector.shape_cast %36 : vector<1x8x128xf32> to vector<8x128xf32>
    %c0_19 = arith.constant 0 : index
    %c0_20 = arith.constant 0 : index
    %38 = vector.load %arg3[%c0_19, %c0_20] : memref<128x128xf32, #tpu.memory_space<vmem>>, vector<128x128xf32>
    %c0_21 = arith.constant 0 : index
    %c0_22 = arith.constant 0 : index
    %39 = vector.load %arg4[%c0_21, %c0_22] : memref<128x128xf32, #tpu.memory_space<vmem>>, vector<128x128xf32>
    %cst_23 = arith.constant dense<0.000000e+00> : vector<8x128xf32>
    %40 = tpu.matmul %37, %38, %cst_23 {dimension_numbers = #tpu.dot_dimension_numbers<[1], [0], [0], [1], [0, 0, 1, 1], [], []>} : vector<8x128xf32>, vector<128x128xf32>, vector<8x128xf32> -> vector<8x128xf32>
    %cst_24 = arith.constant dense<0.000000e+00> : vector<8x128xf32>
    %41 = tpu.matmul %30, %38, %cst_24 {dimension_numbers = #tpu.dot_dimension_numbers<[1], [0], [0], [1], [0, 0, 1, 1], [], []>} : vector<8x128xf32>, vector<128x128xf32>, vector<8x128xf32> -> vector<8x128xf32>
    %cst_25 = arith.constant dense<0.000000e+00> : vector<8x128xf32>
    %42 = tpu.matmul %30, %39, %cst_25 {dimension_numbers = #tpu.dot_dimension_numbers<[1], [0], [0], [1], [0, 0, 1, 1], [], []>} : vector<8x128xf32>, vector<128x128xf32>, vector<8x128xf32> -> vector<8x128xf32>
    %43 = tpu.concatenate %40, %37, %41, %30, %42 in 0 : vector<8x128xf32>, vector<8x128xf32>, vector<8x128xf32>, vector<8x128xf32>, vector<8x128xf32> -> vector<40x128xf32>
    %cst_26 = arith.constant dense<0.000000e+00> : vector<32x128xf32>
    %44 = tpu.matmul %0, %43, %cst_26 {dimension_numbers = #tpu.dot_dimension_numbers<[1], [0], [0], [1], [0, 0, 1, 1], [], []>} : vector<32x40xf32>, vector<40x128xf32>, vector<32x128xf32> -> vector<32x128xf32>
    %45 = arith.addf %44, %3 : vector<32x128xf32>
    %46 = arith.negf %45 : vector<32x128xf32>
    %47 = math.exp %46 : vector<32x128xf32>
    %cst_27 = arith.constant 1.000000e+00 : f32
    %48 = vector.broadcast %cst_27 : f32 to vector<32x128xf32>
    %49 = arith.addf %48, %47 : vector<32x128xf32>
    %50 = arith.divf %48, %49 : vector<32x128xf32>
    %51 = vector.extract_strided_slice %50 {offsets = [0, 0], sizes = [8, 128], strides = [1, 1]} : vector<32x128xf32> to vector<8x128xf32>
    %52 = vector.extract_strided_slice %50 {offsets = [8, 0], sizes = [8, 128], strides = [1, 1]} : vector<32x128xf32> to vector<8x128xf32>
    %53 = vector.extract_strided_slice %50 {offsets = [16, 0], sizes = [8, 128], strides = [1, 1]} : vector<32x128xf32> to vector<8x128xf32>
    %54 = vector.extract_strided_slice %50 {offsets = [24, 0], sizes = [8, 128], strides = [1, 1]} : vector<32x128xf32> to vector<8x128xf32>
    %55 = arith.mulf %53, %28 : vector<8x128xf32>
    %56 = arith.mulf %51, %52 : vector<8x128xf32>
    %57 = arith.addf %55, %56 : vector<8x128xf32>
    %58 = math.tanh %57 : vector<8x128xf32>
    %59 = arith.mulf %54, %58 : vector<8x128xf32>
    %60 = arith.index_cast %c1_i32 : i32 to index
    %c0_28 = arith.constant 0 : index
    %c0_29 = arith.constant 0 : index
    %61 = vector.load %arg5[%60, %c0_28, %c0_29] : memref<8x8x128xf32, #tpu.memory_space<vmem>>, vector<1x8x128xf32>
    %62 = vector.shape_cast %61 : vector<1x8x128xf32> to vector<8x128xf32>
    %63 = vector.shape_cast %59 : vector<8x128xf32> to vector<1x8x128xf32>
    tpu.vector_store %arg5[%60, %c0_28, %c0_29], %63 {strides = array<i32>} : memref<8x8x128xf32, #tpu.memory_space<vmem>>, vector<1x8x128xf32>,
    %c2_i32 = arith.constant 2 : i32
    %64 = arith.index_cast %c2_i32 : i32 to index
    %c0_30 = arith.constant 0 : index
    %c0_31 = arith.constant 0 : index
    %65 = vector.load %arg0[%64, %c0_30, %c0_31] : memref<8x8x128xf32, #tpu.memory_space<vmem>>, vector<1x8x128xf32>
    %66 = vector.shape_cast %65 : vector<1x8x128xf32> to vector<8x128xf32>
    %c0_32 = arith.constant 0 : index
    %c0_33 = arith.constant 0 : index
    %67 = vector.load %arg3[%c0_32, %c0_33] : memref<128x128xf32, #tpu.memory_space<vmem>>, vector<128x128xf32>
    %c0_34 = arith.constant 0 : index
    %c0_35 = arith.constant 0 : index
    %68 = vector.load %arg4[%c0_34, %c0_35] : memref<128x128xf32, #tpu.memory_space<vmem>>, vector<128x128xf32>
    %cst_36 = arith.constant dense<0.000000e+00> : vector<8x128xf32>
    %69 = tpu.matmul %66, %67, %cst_36 {dimension_numbers = #tpu.dot_dimension_numbers<[1], [0], [0], [1], [0, 0, 1, 1], [], []>} : vector<8x128xf32>, vector<128x128xf32>, vector<8x128xf32> -> vector<8x128xf32>
    %cst_37 = arith.constant dense<0.000000e+00> : vector<8x128xf32>
    %70 = tpu.matmul %59, %67, %cst_37 {dimension_numbers = #tpu.dot_dimension_numbers<[1], [0], [0], [1], [0, 0, 1, 1], [], []>} : vector<8x128xf32>, vector<128x128xf32>, vector<8x128xf32> -> vector<8x128xf32>
    %cst_38 = arith.constant dense<0.000000e+00> : vector<8x128xf32>
    %71 = tpu.matmul %59, %68, %cst_38 {dimension_numbers = #tpu.dot_dimension_numbers<[1], [0], [0], [1], [0, 0, 1, 1], [], []>} : vector<8x128xf32>, vector<128x128xf32>, vector<8x128xf32> -> vector<8x128xf32>
    %72 = tpu.concatenate %69, %66, %70, %59, %71 in 0 : vector<8x128xf32>, vector<8x128xf32>, vector<8x128xf32>, vector<8x128xf32>, vector<8x128xf32> -> vector<40x128xf32>
    %cst_39 = arith.constant dense<0.000000e+00> : vector<32x128xf32>
    %73 = tpu.matmul %0, %72, %cst_39 {dimension_numbers = #tpu.dot_dimension_numbers<[1], [0], [0], [1], [0, 0, 1, 1], [], []>} : vector<32x40xf32>, vector<40x128xf32>, vector<32x128xf32> -> vector<32x128xf32>
    %74 = arith.addf %73, %3 : vector<32x128xf32>
    %75 = arith.negf %74 : vector<32x128xf32>
    %76 = math.exp %75 : vector<32x128xf32>
    %cst_40 = arith.constant 1.000000e+00 : f32
    %77 = vector.broadcast %cst_40 : f32 to vector<32x128xf32>
    %78 = arith.addf %77, %76 : vector<32x128xf32>
    %79 = arith.divf %77, %78 : vector<32x128xf32>
    %80 = vector.extract_strided_slice %79 {offsets = [0, 0], sizes = [8, 128], strides = [1, 1]} : vector<32x128xf32> to vector<8x128xf32>
    %81 = vector.extract_strided_slice %79 {offsets = [8, 0], sizes = [8, 128], strides = [1, 1]} : vector<32x128xf32> to vector<8x128xf32>
    %82 = vector.extract_strided_slice %79 {offsets = [16, 0], sizes = [8, 128], strides = [1, 1]} : vector<32x128xf32> to vector<8x128xf32>
    %83 = vector.extract_strided_slice %79 {offsets = [24, 0], sizes = [8, 128], strides = [1, 1]} : vector<32x128xf32> to vector<8x128xf32>
    %84 = arith.mulf %82, %57 : vector<8x128xf32>
    %85 = arith.mulf %80, %81 : vector<8x128xf32>
    %86 = arith.addf %84, %85 : vector<8x128xf32>
    %87 = math.tanh %86 : vector<8x128xf32>
    %88 = arith.mulf %83, %87 : vector<8x128xf32>
    %89 = arith.index_cast %c2_i32 : i32 to index
    %c0_41 = arith.constant 0 : index
    %c0_42 = arith.constant 0 : index
    %90 = vector.load %arg5[%89, %c0_41, %c0_42] : memref<8x8x128xf32, #tpu.memory_space<vmem>>, vector<1x8x128xf32>
    %91 = vector.shape_cast %90 : vector<1x8x128xf32> to vector<8x128xf32>
    %92 = vector.shape_cast %88 : vector<8x128xf32> to vector<1x8x128xf32>
    tpu.vector_store %arg5[%89, %c0_41, %c0_42], %92 {strides = array<i32>} : memref<8x8x128xf32, #tpu.memory_space<vmem>>, vector<1x8x128xf32>,
    %c3_i32 = arith.constant 3 : i32
    %93 = arith.index_cast %c3_i32 : i32 to index
    %c0_43 = arith.constant 0 : index
    %c0_44 = arith.constant 0 : index
    %94 = vector.load %arg0[%93, %c0_43, %c0_44] : memref<8x8x128xf32, #tpu.memory_space<vmem>>, vector<1x8x128xf32>
    %95 = vector.shape_cast %94 : vector<1x8x128xf32> to vector<8x128xf32>
    %c0_45 = arith.constant 0 : index
    %c0_46 = arith.constant 0 : index
    %96 = vector.load %arg3[%c0_45, %c0_46] : memref<128x128xf32, #tpu.memory_space<vmem>>, vector<128x128xf32>
    %c0_47 = arith.constant 0 : index
    %c0_48 = arith.constant 0 : index
    %97 = vector.load %arg4[%c0_47, %c0_48] : memref<128x128xf32, #tpu.memory_space<vmem>>, vector<128x128xf32>
    %cst_49 = arith.constant dense<0.000000e+00> : vector<8x128xf32>
    %98 = tpu.matmul %95, %96, %cst_49 {dimension_numbers = #tpu.dot_dimension_numbers<[1], [0], [0], [1], [0, 0, 1, 1], [], []>} : vector<8x128xf32>, vector<128x128xf32>, vector<8x128xf32> -> vector<8x128xf32>
    %cst_50 = arith.constant dense<0.000000e+00> : vector<8x128xf32>
    %99 = tpu.matmul %88, %96, %cst_50 {dimension_numbers = #tpu.dot_dimension_numbers<[1], [0], [0], [1], [0, 0, 1, 1], [], []>} : vector<8x128xf32>, vector<128x128xf32>, vector<8x128xf32> -> vector<8x128xf32>
    %cst_51 = arith.constant dense<0.000000e+00> : vector<8x128xf32>
    %100 = tpu.matmul %88, %97, %cst_51 {dimension_numbers = #tpu.dot_dimension_numbers<[1], [0], [0], [1], [0, 0, 1, 1], [], []>} : vector<8x128xf32>, vector<128x128xf32>, vector<8x128xf32> -> vector<8x128xf32>
    %101 = tpu.concatenate %98, %95, %99, %88, %100 in 0 : vector<8x128xf32>, vector<8x128xf32>, vector<8x128xf32>, vector<8x128xf32>, vector<8x128xf32> -> vector<40x128xf32>
    %cst_52 = arith.constant dense<0.000000e+00> : vector<32x128xf32>
    %102 = tpu.matmul %0, %101, %cst_52 {dimension_numbers = #tpu.dot_dimension_numbers<[1], [0], [0], [1], [0, 0, 1, 1], [], []>} : vector<32x40xf32>, vector<40x128xf32>, vector<32x128xf32> -> vector<32x128xf32>
    %103 = arith.addf %102, %3 : vector<32x128xf32>
    %104 = arith.negf %103 : vector<32x128xf32>
    %105 = math.exp %104 : vector<32x128xf32>
    %cst_53 = arith.constant 1.000000e+00 : f32
    %106 = vector.broadcast %cst_53 : f32 to vector<32x128xf32>
    %107 = arith.addf %106, %105 : vector<32x128xf32>
    %108 = arith.divf %106, %107 : vector<32x128xf32>
    %109 = vector.extract_strided_slice %108 {offsets = [0, 0], sizes = [8, 128], strides = [1, 1]} : vector<32x128xf32> to vector<8x128xf32>
    %110 = vector.extract_strided_slice %108 {offsets = [8, 0], sizes = [8, 128], strides = [1, 1]} : vector<32x128xf32> to vector<8x128xf32>
    %111 = vector.extract_strided_slice %108 {offsets = [16, 0], sizes = [8, 128], strides = [1, 1]} : vector<32x128xf32> to vector<8x128xf32>
    %112 = vector.extract_strided_slice %108 {offsets = [24, 0], sizes = [8, 128], strides = [1, 1]} : vector<32x128xf32> to vector<8x128xf32>
    %113 = arith.mulf %111, %86 : vector<8x128xf32>
    %114 = arith.mulf %109, %110 : vector<8x128xf32>
    %115 = arith.addf %113, %114 : vector<8x128xf32>
    %116 = math.tanh %115 : vector<8x128xf32>
    %117 = arith.mulf %112, %116 : vector<8x128xf32>
    %118 = arith.index_cast %c3_i32 : i32 to index
    %c0_54 = arith.constant 0 : index
    %c0_55 = arith.constant 0 : index
    %119 = vector.load %arg5[%118, %c0_54, %c0_55] : memref<8x8x128xf32, #tpu.memory_space<vmem>>, vector<1x8x128xf32>
    %120 = vector.shape_cast %119 : vector<1x8x128xf32> to vector<8x128xf32>
    %121 = vector.shape_cast %117 : vector<8x128xf32> to vector<1x8x128xf32>
    tpu.vector_store %arg5[%118, %c0_54, %c0_55], %121 {strides = array<i32>} : memref<8x8x128xf32, #tpu.memory_space<vmem>>, vector<1x8x128xf32>,
    %c4_i32 = arith.constant 4 : i32
    %122 = arith.index_cast %c4_i32 : i32 to index
    %c0_56 = arith.constant 0 : index
    %c0_57 = arith.constant 0 : index
    %123 = vector.load %arg0[%122, %c0_56, %c0_57] : memref<8x8x128xf32, #tpu.memory_space<vmem>>, vector<1x8x128xf32>
    %124 = vector.shape_cast %123 : vector<1x8x128xf32> to vector<8x128xf32>
    %c0_58 = arith.constant 0 : index
    %c0_59 = arith.constant 0 : index
    %125 = vector.load %arg3[%c0_58, %c0_59] : memref<128x128xf32, #tpu.memory_space<vmem>>, vector<128x128xf32>
    %c0_60 = arith.constant 0 : index
    %c0_61 = arith.constant 0 : index
    %126 = vector.load %arg4[%c0_60, %c0_61] : memref<128x128xf32, #tpu.memory_space<vmem>>, vector<128x128xf32>
    %cst_62 = arith.constant dense<0.000000e+00> : vector<8x128xf32>
    %127 = tpu.matmul %124, %125, %cst_62 {dimension_numbers = #tpu.dot_dimension_numbers<[1], [0], [0], [1], [0, 0, 1, 1], [], []>} : vector<8x128xf32>, vector<128x128xf32>, vector<8x128xf32> -> vector<8x128xf32>
    %cst_63 = arith.constant dense<0.000000e+00> : vector<8x128xf32>
    %128 = tpu.matmul %117, %125, %cst_63 {dimension_numbers = #tpu.dot_dimension_numbers<[1], [0], [0], [1], [0, 0, 1, 1], [], []>} : vector<8x128xf32>, vector<128x128xf32>, vector<8x128xf32> -> vector<8x128xf32>
    %cst_64 = arith.constant dense<0.000000e+00> : vector<8x128xf32>
    %129 = tpu.matmul %117, %126, %cst_64 {dimension_numbers = #tpu.dot_dimension_numbers<[1], [0], [0], [1], [0, 0, 1, 1], [], []>} : vector<8x128xf32>, vector<128x128xf32>, vector<8x128xf32> -> vector<8x128xf32>
    %130 = tpu.concatenate %127, %124, %128, %117, %129 in 0 : vector<8x128xf32>, vector<8x128xf32>, vector<8x128xf32>, vector<8x128xf32>, vector<8x128xf32> -> vector<40x128xf32>
    %cst_65 = arith.constant dense<0.000000e+00> : vector<32x128xf32>
    %131 = tpu.matmul %0, %130, %cst_65 {dimension_numbers = #tpu.dot_dimension_numbers<[1], [0], [0], [1], [0, 0, 1, 1], [], []>} : vector<32x40xf32>, vector<40x128xf32>, vector<32x128xf32> -> vector<32x128xf32>
    %132 = arith.addf %131, %3 : vector<32x128xf32>
    %133 = arith.negf %132 : vector<32x128xf32>
    %134 = math.exp %133 : vector<32x128xf32>
    %cst_66 = arith.constant 1.000000e+00 : f32
    %135 = vector.broadcast %cst_66 : f32 to vector<32x128xf32>
    %136 = arith.addf %135, %134 : vector<32x128xf32>
    %137 = arith.divf %135, %136 : vector<32x128xf32>
    %138 = vector.extract_strided_slice %137 {offsets = [0, 0], sizes = [8, 128], strides = [1, 1]} : vector<32x128xf32> to vector<8x128xf32>
    %139 = vector.extract_strided_slice %137 {offsets = [8, 0], sizes = [8, 128], strides = [1, 1]} : vector<32x128xf32> to vector<8x128xf32>
    %140 = vector.extract_strided_slice %137 {offsets = [16, 0], sizes = [8, 128], strides = [1, 1]} : vector<32x128xf32> to vector<8x128xf32>
    %141 = vector.extract_strided_slice %137 {offsets = [24, 0], sizes = [8, 128], strides = [1, 1]} : vector<32x128xf32> to vector<8x128xf32>
    %142 = arith.mulf %140, %115 : vector<8x128xf32>
    %143 = arith.mulf %138, %139 : vector<8x128xf32>
    %144 = arith.addf %142, %143 : vector<8x128xf32>
    %145 = math.tanh %144 : vector<8x128xf32>
    %146 = arith.mulf %141, %145 : vector<8x128xf32>
    %147 = arith.index_cast %c4_i32 : i32 to index
    %c0_67 = arith.constant 0 : index
    %c0_68 = arith.constant 0 : index
    %148 = vector.load %arg5[%147, %c0_67, %c0_68] : memref<8x8x128xf32, #tpu.memory_space<vmem>>, vector<1x8x128xf32>
    %149 = vector.shape_cast %148 : vector<1x8x128xf32> to vector<8x128xf32>
    %150 = vector.shape_cast %146 : vector<8x128xf32> to vector<1x8x128xf32>
    tpu.vector_store %arg5[%147, %c0_67, %c0_68], %150 {strides = array<i32>} : memref<8x8x128xf32, #tpu.memory_space<vmem>>, vector<1x8x128xf32>,
    %c5_i32 = arith.constant 5 : i32
    %151 = arith.index_cast %c5_i32 : i32 to index
    %c0_69 = arith.constant 0 : index
    %c0_70 = arith.constant 0 : index
    %152 = vector.load %arg0[%151, %c0_69, %c0_70] : memref<8x8x128xf32, #tpu.memory_space<vmem>>, vector<1x8x128xf32>
    %153 = vector.shape_cast %152 : vector<1x8x128xf32> to vector<8x128xf32>
    %c0_71 = arith.constant 0 : index
    %c0_72 = arith.constant 0 : index
    %154 = vector.load %arg3[%c0_71, %c0_72] : memref<128x128xf32, #tpu.memory_space<vmem>>, vector<128x128xf32>
    %c0_73 = arith.constant 0 : index
    %c0_74 = arith.constant 0 : index
    %155 = vector.load %arg4[%c0_73, %c0_74] : memref<128x128xf32, #tpu.memory_space<vmem>>, vector<128x128xf32>
    %cst_75 = arith.constant dense<0.000000e+00> : vector<8x128xf32>
    %156 = tpu.matmul %153, %154, %cst_75 {dimension_numbers = #tpu.dot_dimension_numbers<[1], [0], [0], [1], [0, 0, 1, 1], [], []>} : vector<8x128xf32>, vector<128x128xf32>, vector<8x128xf32> -> vector<8x128xf32>
    %cst_76 = arith.constant dense<0.000000e+00> : vector<8x128xf32>
    %157 = tpu.matmul %146, %154, %cst_76 {dimension_numbers = #tpu.dot_dimension_numbers<[1], [0], [0], [1], [0, 0, 1, 1], [], []>} : vector<8x128xf32>, vector<128x128xf32>, vector<8x128xf32> -> vector<8x128xf32>
    %cst_77 = arith.constant dense<0.000000e+00> : vector<8x128xf32>
    %158 = tpu.matmul %146, %155, %cst_77 {dimension_numbers = #tpu.dot_dimension_numbers<[1], [0], [0], [1], [0, 0, 1, 1], [], []>} : vector<8x128xf32>, vector<128x128xf32>, vector<8x128xf32> -> vector<8x128xf32>
    %159 = tpu.concatenate %156, %153, %157, %146, %158 in 0 : vector<8x128xf32>, vector<8x128xf32>, vector<8x128xf32>, vector<8x128xf32>, vector<8x128xf32> -> vector<40x128xf32>
    %cst_78 = arith.constant dense<0.000000e+00> : vector<32x128xf32>
    %160 = tpu.matmul %0, %159, %cst_78 {dimension_numbers = #tpu.dot_dimension_numbers<[1], [0], [0], [1], [0, 0, 1, 1], [], []>} : vector<32x40xf32>, vector<40x128xf32>, vector<32x128xf32> -> vector<32x128xf32>
    %161 = arith.addf %160, %3 : vector<32x128xf32>
    %162 = arith.negf %161 : vector<32x128xf32>
    %163 = math.exp %162 : vector<32x128xf32>
    %cst_79 = arith.constant 1.000000e+00 : f32
    %164 = vector.broadcast %cst_79 : f32 to vector<32x128xf32>
    %165 = arith.addf %164, %163 : vector<32x128xf32>
    %166 = arith.divf %164, %165 : vector<32x128xf32>
    %167 = vector.extract_strided_slice %166 {offsets = [0, 0], sizes = [8, 128], strides = [1, 1]} : vector<32x128xf32> to vector<8x128xf32>
    %168 = vector.extract_strided_slice %166 {offsets = [8, 0], sizes = [8, 128], strides = [1, 1]} : vector<32x128xf32> to vector<8x128xf32>
    %169 = vector.extract_strided_slice %166 {offsets = [16, 0], sizes = [8, 128], strides = [1, 1]} : vector<32x128xf32> to vector<8x128xf32>
    %170 = vector.extract_strided_slice %166 {offsets = [24, 0], sizes = [8, 128], strides = [1, 1]} : vector<32x128xf32> to vector<8x128xf32>
    %171 = arith.mulf %169, %144 : vector<8x128xf32>
    %172 = arith.mulf %167, %168 : vector<8x128xf32>
    %173 = arith.addf %171, %172 : vector<8x128xf32>
    %174 = math.tanh %173 : vector<8x128xf32>
    %175 = arith.mulf %170, %174 : vector<8x128xf32>
    %176 = arith.index_cast %c5_i32 : i32 to index
    %c0_80 = arith.constant 0 : index
    %c0_81 = arith.constant 0 : index
    %177 = vector.load %arg5[%176, %c0_80, %c0_81] : memref<8x8x128xf32, #tpu.memory_space<vmem>>, vector<1x8x128xf32>
    %178 = vector.shape_cast %177 : vector<1x8x128xf32> to vector<8x128xf32>
    %179 = vector.shape_cast %175 : vector<8x128xf32> to vector<1x8x128xf32>
    tpu.vector_store %arg5[%176, %c0_80, %c0_81], %179 {strides = array<i32>} : memref<8x8x128xf32, #tpu.memory_space<vmem>>, vector<1x8x128xf32>,
    %c6_i32 = arith.constant 6 : i32
    %180 = arith.index_cast %c6_i32 : i32 to index
    %c0_82 = arith.constant 0 : index
    %c0_83 = arith.constant 0 : index
    %181 = vector.load %arg0[%180, %c0_82, %c0_83] : memref<8x8x128xf32, #tpu.memory_space<vmem>>, vector<1x8x128xf32>
    %182 = vector.shape_cast %181 : vector<1x8x128xf32> to vector<8x128xf32>
    %c0_84 = arith.constant 0 : index
    %c0_85 = arith.constant 0 : index
    %183 = vector.load %arg3[%c0_84, %c0_85] : memref<128x128xf32, #tpu.memory_space<vmem>>, vector<128x128xf32>
    %c0_86 = arith.constant 0 : index
    %c0_87 = arith.constant 0 : index
    %184 = vector.load %arg4[%c0_86, %c0_87] : memref<128x128xf32, #tpu.memory_space<vmem>>, vector<128x128xf32>
    %cst_88 = arith.constant dense<0.000000e+00> : vector<8x128xf32>
    %185 = tpu.matmul %182, %183, %cst_88 {dimension_numbers = #tpu.dot_dimension_numbers<[1], [0], [0], [1], [0, 0, 1, 1], [], []>} : vector<8x128xf32>, vector<128x128xf32>, vector<8x128xf32> -> vector<8x128xf32>
    %cst_89 = arith.constant dense<0.000000e+00> : vector<8x128xf32>
    %186 = tpu.matmul %175, %183, %cst_89 {dimension_numbers = #tpu.dot_dimension_numbers<[1], [0], [0], [1], [0, 0, 1, 1], [], []>} : vector<8x128xf32>, vector<128x128xf32>, vector<8x128xf32> -> vector<8x128xf32>
    %cst_90 = arith.constant dense<0.000000e+00> : vector<8x128xf32>
    %187 = tpu.matmul %175, %184, %cst_90 {dimension_numbers = #tpu.dot_dimension_numbers<[1], [0], [0], [1], [0, 0, 1, 1], [], []>} : vector<8x128xf32>, vector<128x128xf32>, vector<8x128xf32> -> vector<8x128xf32>
    %188 = tpu.concatenate %185, %182, %186, %175, %187 in 0 : vector<8x128xf32>, vector<8x128xf32>, vector<8x128xf32>, vector<8x128xf32>, vector<8x128xf32> -> vector<40x128xf32>
    %cst_91 = arith.constant dense<0.000000e+00> : vector<32x128xf32>
    %189 = tpu.matmul %0, %188, %cst_91 {dimension_numbers = #tpu.dot_dimension_numbers<[1], [0], [0], [1], [0, 0, 1, 1], [], []>} : vector<32x40xf32>, vector<40x128xf32>, vector<32x128xf32> -> vector<32x128xf32>
    %190 = arith.addf %189, %3 : vector<32x128xf32>
    %191 = arith.negf %190 : vector<32x128xf32>
    %192 = math.exp %191 : vector<32x128xf32>
    %cst_92 = arith.constant 1.000000e+00 : f32
    %193 = vector.broadcast %cst_92 : f32 to vector<32x128xf32>
    %194 = arith.addf %193, %192 : vector<32x128xf32>
    %195 = arith.divf %193, %194 : vector<32x128xf32>
    %196 = vector.extract_strided_slice %195 {offsets = [0, 0], sizes = [8, 128], strides = [1, 1]} : vector<32x128xf32> to vector<8x128xf32>
    %197 = vector.extract_strided_slice %195 {offsets = [8, 0], sizes = [8, 128], strides = [1, 1]} : vector<32x128xf32> to vector<8x128xf32>
    %198 = vector.extract_strided_slice %195 {offsets = [16, 0], sizes = [8, 128], strides = [1, 1]} : vector<32x128xf32> to vector<8x128xf32>
    %199 = vector.extract_strided_slice %195 {offsets = [24, 0], sizes = [8, 128], strides = [1, 1]} : vector<32x128xf32> to vector<8x128xf32>
    %200 = arith.mulf %198, %173 : vector<8x128xf32>
    %201 = arith.mulf %196, %197 : vector<8x128xf32>
    %202 = arith.addf %200, %201 : vector<8x128xf32>
    %203 = math.tanh %202 : vector<8x128xf32>
    %204 = arith.mulf %199, %203 : vector<8x128xf32>
    %205 = arith.index_cast %c6_i32 : i32 to index
    %c0_93 = arith.constant 0 : index
    %c0_94 = arith.constant 0 : index
    %206 = vector.load %arg5[%205, %c0_93, %c0_94] : memref<8x8x128xf32, #tpu.memory_space<vmem>>, vector<1x8x128xf32>
    %207 = vector.shape_cast %206 : vector<1x8x128xf32> to vector<8x128xf32>
    %208 = vector.shape_cast %204 : vector<8x128xf32> to vector<1x8x128xf32>
    tpu.vector_store %arg5[%205, %c0_93, %c0_94], %208 {strides = array<i32>} : memref<8x8x128xf32, #tpu.memory_space<vmem>>, vector<1x8x128xf32>,
    %c7_i32 = arith.constant 7 : i32
    %209 = arith.index_cast %c7_i32 : i32 to index
    %c0_95 = arith.constant 0 : index
    %c0_96 = arith.constant 0 : index
    %210 = vector.load %arg0[%209, %c0_95, %c0_96] : memref<8x8x128xf32, #tpu.memory_space<vmem>>, vector<1x8x128xf32>
    %211 = vector.shape_cast %210 : vector<1x8x128xf32> to vector<8x128xf32>
    %c0_97 = arith.constant 0 : index
    %c0_98 = arith.constant 0 : index
    %212 = vector.load %arg3[%c0_97, %c0_98] : memref<128x128xf32, #tpu.memory_space<vmem>>, vector<128x128xf32>
    %c0_99 = arith.constant 0 : index
    %c0_100 = arith.constant 0 : index
    %213 = vector.load %arg4[%c0_99, %c0_100] : memref<128x128xf32, #tpu.memory_space<vmem>>, vector<128x128xf32>
    %cst_101 = arith.constant dense<0.000000e+00> : vector<8x128xf32>
    %214 = tpu.matmul %211, %212, %cst_101 {dimension_numbers = #tpu.dot_dimension_numbers<[1], [0], [0], [1], [0, 0, 1, 1], [], []>} : vector<8x128xf32>, vector<128x128xf32>, vector<8x128xf32> -> vector<8x128xf32>
    %cst_102 = arith.constant dense<0.000000e+00> : vector<8x128xf32>
    %215 = tpu.matmul %204, %212, %cst_102 {dimension_numbers = #tpu.dot_dimension_numbers<[1], [0], [0], [1], [0, 0, 1, 1], [], []>} : vector<8x128xf32>, vector<128x128xf32>, vector<8x128xf32> -> vector<8x128xf32>
    %cst_103 = arith.constant dense<0.000000e+00> : vector<8x128xf32>
    %216 = tpu.matmul %204, %213, %cst_103 {dimension_numbers = #tpu.dot_dimension_numbers<[1], [0], [0], [1], [0, 0, 1, 1], [], []>} : vector<8x128xf32>, vector<128x128xf32>, vector<8x128xf32> -> vector<8x128xf32>
    %217 = tpu.concatenate %214, %211, %215, %204, %216 in 0 : vector<8x128xf32>, vector<8x128xf32>, vector<8x128xf32>, vector<8x128xf32>, vector<8x128xf32> -> vector<40x128xf32>
    %cst_104 = arith.constant dense<0.000000e+00> : vector<32x128xf32>
    %218 = tpu.matmul %0, %217, %cst_104 {dimension_numbers = #tpu.dot_dimension_numbers<[1], [0], [0], [1], [0, 0, 1, 1], [], []>} : vector<32x40xf32>, vector<40x128xf32>, vector<32x128xf32> -> vector<32x128xf32>
    %219 = arith.addf %218, %3 : vector<32x128xf32>
    %220 = arith.negf %219 : vector<32x128xf32>
    %221 = math.exp %220 : vector<32x128xf32>
    %cst_105 = arith.constant 1.000000e+00 : f32
    %222 = vector.broadcast %cst_105 : f32 to vector<32x128xf32>
    %223 = arith.addf %222, %221 : vector<32x128xf32>
    %224 = arith.divf %222, %223 : vector<32x128xf32>
    %225 = vector.extract_strided_slice %224 {offsets = [0, 0], sizes = [8, 128], strides = [1, 1]} : vector<32x128xf32> to vector<8x128xf32>
    %226 = vector.extract_strided_slice %224 {offsets = [8, 0], sizes = [8, 128], strides = [1, 1]} : vector<32x128xf32> to vector<8x128xf32>
    %227 = vector.extract_strided_slice %224 {offsets = [16, 0], sizes = [8, 128], strides = [1, 1]} : vector<32x128xf32> to vector<8x128xf32>
    %228 = vector.extract_strided_slice %224 {offsets = [24, 0], sizes = [8, 128], strides = [1, 1]} : vector<32x128xf32> to vector<8x128xf32>
    %229 = arith.mulf %227, %202 : vector<8x128xf32>
    %230 = arith.mulf %225, %226 : vector<8x128xf32>
    %231 = arith.addf %229, %230 : vector<8x128xf32>
    %232 = math.tanh %231 : vector<8x128xf32>
    %233 = arith.mulf %228, %232 : vector<8x128xf32>
    %234 = arith.index_cast %c7_i32 : i32 to index
    %c0_106 = arith.constant 0 : index
    %c0_107 = arith.constant 0 : index
    %235 = vector.load %arg5[%234, %c0_106, %c0_107] : memref<8x8x128xf32, #tpu.memory_space<vmem>>, vector<1x8x128xf32>
    %236 = vector.shape_cast %235 : vector<1x8x128xf32> to vector<8x128xf32>
    %237 = vector.shape_cast %233 : vector<8x128xf32> to vector<1x8x128xf32>
    tpu.vector_store %arg5[%234, %c0_106, %c0_107], %237 {strides = array<i32>} : memref<8x8x128xf32, #tpu.memory_space<vmem>>, vector<1x8x128xf32>,
    %c8_i32 = arith.constant 8 : i32
    return
  }
}

</mosaic_0001>

<bundles_post_ra>
// kernel: row_lstm_forward.1
= control target key start
LH: loop header
LB: loop body
LE: loop exit
PB: predicated region body
PF: predicated region fallthrough
CT: control target
= control target key end

     0   :  { %v1946_v33 = vmov 0.0   ;;  %v1947_v34 = vmov 0   ;;  %vm141_vm0 = vcmask 326656   ;;  %s3243_s4 = inlined_call_operand.vmem [shape: f32[128,128], index: 4, kind: input, shape index: {}]   ;;  %s3244_s3 = inlined_call_operand.vmem [shape: f32[128,128], index: 3, kind: input, shape index: {}]   ;;  %s3245_s0 = inlined_call_operand.vmem [shape: f32[8,8,128], index: 0, kind: input, shape index: {}]   ;;  %s3246_s2 = inlined_call_operand.vmem [shape: f32[32,1], index: 2, kind: input, shape index: {}]   ;;  %s3247_s1 = inlined_call_operand.vmem [shape: f32[32,40], index: 1, kind: input, shape index: {}]   ;;  %s3248_s5 = inlined_call_operand.vmem [shape: f32[8,8,128], index: 5, kind: output, shape index: {}]  }
   0x1   :  { %v1981_v0 = vld [vmem:[%s3243_s4 + $0x78] sm:$0xff]  ;;  %v1986_v1 = vld [vmem:[%s3243_s4 + $0x70] sm:$0xff]  ;;  %v1997_v3 = vld [vmem:[%s3243_s4 + $0x68] sm:$0xff]  ;;  %1796 = vset.pattern.permute.xlu0 %v1947_v34  ;;  %1797 = vset.pattern.permute.xlu1 %v1947_v34 }
   0x2   :  { %121 = vmatpush.msra.mxu2 %v1981_v0  ;;  %v1992_v2 = vld [vmem:[%s3244_s3 + $0x78] sm:$0xff]  ;;  %v2003_v4 = vld [vmem:[%s3244_s3 + $0x70] sm:$0xff]  ;;  %v2010_v5 = vld [vmem:[%s3244_s3 + $0x68] sm:$0xff] }
   0x3   :  { %101 = vmatpush.msra.mxu1 %v1992_v2  ;;  %81 = vmatpush.msra.mxu0 %v1992_v2  ;;  %v2015_v6 = vld [vmem:[%s3243_s4 + $0x60] sm:$0xff]  ;;  %v2028_v8 = vld [vmem:[%s3243_s4 + $0x58] sm:$0xff]  ;;  %v2041_v10 = vld [vmem:[%s3243_s4 + $0x50] sm:$0xff] }
   0x4   :  { %122 = vmatpush.msra.mxu2 %v1986_v1  ;;  %v2023_v7 = vld [vmem:[%s3244_s3 + $0x60] sm:$0xff]  ;;  %v2036_v9 = vld [vmem:[%s3244_s3 + $0x58] sm:$0xff]  ;;  %v2049_v11 = vld [vmem:[%s3244_s3 + $0x50] sm:$0xff] }
   0x5   :  { %102 = vmatpush.msra.mxu1 %v2003_v4  ;;  %82 = vmatpush.msra.mxu0 %v2003_v4  ;;  %v2054_v12 = vld [vmem:[%s3243_s4 + $0x48] sm:$0xff]  ;;  %v2067_v14 = vld [vmem:[%s3243_s4 + $0x40] sm:$0xff]  ;;  %v2080_v16 = vld [vmem:[%s3243_s4 + $0x38] sm:$0xff] }
   0x6   :  { %123 = vmatpush.msra.mxu2 %v1997_v3  ;;  %v2062_v13 = vld [vmem:[%s3244_s3 + $0x48] sm:$0xff]  ;;  %v2075_v15 = vld [vmem:[%s3244_s3 + $0x40] sm:$0xff]  ;;  %v2088_v17 = vld [vmem:[%s3244_s3 + $0x38] sm:$0xff] }
   0x7   :  { %103 = vmatpush.msra.mxu1 %v2010_v5  ;;  %83 = vmatpush.msra.mxu0 %v2010_v5  ;;  %v2093_v18 = vld [vmem:[%s3243_s4 + $0x30] sm:$0xff]  ;;  %v2106_v20 = vld [vmem:[%s3243_s4 + $0x28] sm:$0xff]  ;;  %v2119_v22 = vld [vmem:[%s3243_s4 + $0x20] sm:$0xff] }
   0x8   :  { %124 = vmatpush.msra.mxu2 %v2015_v6  ;;  %v2101_v19 = vld [vmem:[%s3244_s3 + $0x30] sm:$0xff]  ;;  %v2114_v21 = vld [vmem:[%s3244_s3 + $0x28] sm:$0xff]  ;;  %v2127_v23 = vld [vmem:[%s3244_s3 + $0x20] sm:$0xff] }
   0x9   :  { %104 = vmatpush.msra.mxu1 %v2023_v7  ;;  %84 = vmatpush.msra.mxu0 %v2023_v7  ;;  %v2132_v24 = vld [vmem:[%s3243_s4 + $0x18] sm:$0xff]  ;;  %v2145_v26 = vld [vmem:[%s3243_s4 + $0x10] sm:$0xff]  ;;  %v2158_v28 = vld [vmem:[%s3243_s4 + $0x8] sm:$0xff] }
   0xa   :  { %125 = vmatpush.msra.mxu2 %v2028_v8  ;;  %v2140_v25 = vld [vmem:[%s3244_s3 + $0x18] sm:$0xff]  ;;  %v2153_v27 = vld [vmem:[%s3244_s3 + $0x10] sm:$0xff]  ;;  %v2166_v29 = vld [vmem:[%s3244_s3 + $0x8] sm:$0xff] }
   0xb   :  { %105 = vmatpush.msra.mxu1 %v2036_v9  ;;  %85 = vmatpush.msra.mxu0 %v2036_v9  ;;  %v65_v30 = vld [vmem:[%s3243_s4] sm:$0xff]  ;;  %v26_v38 = vld [vmem:[%s3246_s2 + $0x10] sm:$0xff]  ;;  %v25_v39 = vld [vmem:[%s3246_s2 + $0x8] sm:$0xff] }
   0xc   :  { %126 = vmatpush.msra.mxu2 %v2041_v10  ;;  %v2177_v31 = vld [vmem:[%s3244_s3] sm:$0xff]  ;;  %40 = vperm.xlu1 %1797, %v26_v38   ;;  %v27_v42 = vld [vmem:[%s3246_s2 + $0x18] sm:$0xff]  ;;  %v2263_v43 = vld [vmem:[%s3247_s1 + $0x8] sm:$0xff] }
   0xd   :  { %106 = vmatpush.msra.mxu1 %v2049_v11  ;;  %86 = vmatpush.msra.mxu0 %v2049_v11  ;;  %v2184_v32 = vld [vmem:[%s3245_s0] sm:$0xff]  ;;  %v2274_v44 = vld [vmem:[%s3247_s1 + $0x10] sm:$0xff]  ;;  %v2285_v45 = vld [vmem:[%s3247_s1 + $0x18] sm:$0xff] }
   0xe   :  { %127 = vmatpush.msra.mxu2 %v2054_v12  ;;  %v24_v35 = vld [vmem:[%s3246_s2] sm:$0xff] }
   0xf   :  { %107 = vmatpush.msra.mxu1 %v2062_v13  ;;  %87 = vmatpush.msra.mxu0 %v2062_v13  ;;  %v2251_v41 = vld [vmem:[%s3247_s1] sm:$0xff] }
  0x10   :  { %128 = vmatpush.msra.mxu2 %v2067_v14  ;;  %30 = vperm.xlu0 %1796, %v24_v35  }
  0x11   :  { %108 = vmatpush.msra.mxu1 %v2075_v15  ;;  %88 = vmatpush.msra.mxu0 %v2075_v15 }
  0x12   :  { %129 = vmatpush.msra.mxu2 %v2080_v16 }
  0x13   :  { %109 = vmatpush.msra.mxu1 %v2088_v17  ;;  %89 = vmatpush.msra.mxu0 %v2088_v17 }
  0x14   :  { %130 = vmatpush.msra.mxu2 %v2093_v18  ;;  %45 = vperm.xlu1 %1797, %v27_v42  }
  0x15   :  { %110 = vmatpush.msra.mxu1 %v2101_v19  ;;  %90 = vmatpush.msra.mxu0 %v2101_v19 }
  0x16   :  { %131 = vmatpush.msra.mxu2 %v2106_v20 }
  0x17   :  { %111 = vmatpush.msra.mxu1 %v2114_v21  ;;  %91 = vmatpush.msra.mxu0 %v2114_v21 }
  0x18   :  { %132 = vmatpush.msra.mxu2 %v2119_v22  ;;  %35 = vperm.xlu0 %1796, %v25_v39  }
  0x19   :  { %112 = vmatpush.msra.mxu1 %v2127_v23  ;;  %92 = vmatpush.msra.mxu0 %v2127_v23 }
  0x1a   :  { %133 = vmatpush.msra.mxu2 %v2132_v24 }
  0x1b   :  { %113 = vmatpush.msra.mxu1 %v2140_v25  ;;  %93 = vmatpush.msra.mxu0 %v2140_v25 }
  0x1c   :  { %134 = vmatpush.msra.mxu2 %v2145_v26 }
  0x1d   :  { %114 = vmatpush.msra.mxu1 %v2153_v27  ;;  %94 = vmatpush.msra.mxu0 %v2153_v27 }
  0x1e   :  { %135 = vmatpush.msra.mxu2 %v2158_v28 }
  0x1f   :  { %115 = vmatpush.msra.mxu1 %v2166_v29  ;;  %95 = vmatpush.msra.mxu0 %v2166_v29 }
  0x20   :  { %136 = vmatpush.msra.mxu2 %v65_v30 }
  0x21   :  { %137 = vmatmul.f32.vlgmr.msra.gmra.mxu2 %v1946_v33  ;;  %116 = vmatpush.msra.mxu1 %v2177_v31 }
  0x22   :  { %117 = vmatmul.f32.vlgmr.msra.gmra.mxu1 %v1946_v33  ;;  %96 = vmatpush.msra.mxu0 %v2177_v31 }
  0x23   :  { %97 = vmatmul.f32.vlgmr.msra.gmra.mxu0 %v2184_v32  ;;  %339 = vmatpush.msrb.mxu1 %v1981_v0 }
  0x24   :  { %319 = vmatpush.msrb.mxu0 %v1992_v2 }
  0x25   :  { %340 = vmatpush.msrb.mxu1 %v1986_v1 }
  0x26   :  { %320 = vmatpush.msrb.mxu0 %v2003_v4 }
  0x27   :  { %341 = vmatpush.msrb.mxu1 %v1997_v3 }
  0x28   :  { %321 = vmatpush.msrb.mxu0 %v2010_v5 }
  0x29   :  { %342 = vmatpush.msrb.mxu1 %v2015_v6 }
  0x2a   :  { %322 = vmatpush.msrb.mxu0 %v2023_v7 }
  0x2b   :  { %343 = vmatpush.msrb.mxu1 %v2028_v8 }
  0x2c   :  { %323 = vmatpush.msrb.mxu0 %v2036_v9 }
  0x2d   :  { %344 = vmatpush.msrb.mxu1 %v2041_v10 }
  0x2e   :  { %324 = vmatpush.msrb.mxu0 %v2049_v11 }
  0x2f   :  { %345 = vmatpush.msrb.mxu1 %v2054_v12 }
  0x30   :  { %325 = vmatpush.msrb.mxu0 %v2062_v13 }
  0x31   :  { %346 = vmatpush.msrb.mxu1 %v2067_v14 }
  0x32   :  { %326 = vmatpush.msrb.mxu0 %v2075_v15 }
  0x33   :  { %347 = vmatpush.msrb.mxu1 %v2080_v16 }
  0x34   :  { %327 = vmatpush.msrb.mxu0 %v2088_v17 }
  0x35   :  { %348 = vmatpush.msrb.mxu1 %v2093_v18 }
  0x36   :  { %328 = vmatpush.msrb.mxu0 %v2101_v19 }
  0x37   :  { %349 = vmatpush.msrb.mxu1 %v2106_v20 }
  0x38   :  { %329 = vmatpush.msrb.mxu0 %v2114_v21 }
  0x39   :  { %350 = vmatpush.msrb.mxu1 %v2119_v22 }
  0x3a   :  { %330 = vmatpush.msrb.mxu0 %v2127_v23 }
  0x3b   :  { %351 = vmatpush.msrb.mxu1 %v2132_v24 }
  0x3c   :  { %331 = vmatpush.msrb.mxu0 %v2140_v25 }
  0x3d   :  { %352 = vmatpush.msrb.mxu1 %v2145_v26 }
  0x3e   :  { %332 = vmatpush.msrb.mxu0 %v2153_v27 }
  0x3f   :  { %353 = vmatpush.msrb.mxu1 %v2158_v28 }
  0x40   :  { %333 = vmatpush.msrb.mxu0 %v2166_v29 }
  0x41   :  { %354 = vmatpush.msrb.mxu1 %v65_v30 }
  0x42   :  { %334 = vmatpush.msrb.mxu0 %v2177_v31 }
  0x44   :  { %545 = vmatpush.msra.mxu0 %v1981_v0 }
  0x46   :  { %546 = vmatpush.msra.mxu0 %v1986_v1 }
  0x48   :  { %547 = vmatpush.msra.mxu0 %v1997_v3 }
  0x4a   :  { %548 = vmatpush.msra.mxu0 %v2015_v6 }
  0x4c   :  { %549 = vmatpush.msra.mxu0 %v2028_v8 }
  0x4e   :  { %550 = vmatpush.msra.mxu0 %v2041_v10 }
  0x50   :  { %551 = vmatpush.msra.mxu0 %v2054_v12 }
  0x52   :  { %552 = vmatpush.msra.mxu0 %v2067_v14  ;;  %v2326_v14 = vld [vmem:[%s3245_s0 + $0x8] sm:$0xff] }
  0x54   :  { %553 = vmatpush.msra.mxu0 %v2080_v16 }
  0x56   :  { %554 = vmatpush.msra.mxu0 %v2093_v18 }
  0x58   :  { %555 = vmatpush.msra.mxu0 %v2106_v20 }
  0x5a   :  { %556 = vmatpush.msra.mxu0 %v2119_v22 }
  0x5c   :  { %557 = vmatpush.msra.mxu0 %v2132_v24 }
  0x5e   :  { %558 = vmatpush.msra.mxu0 %v2145_v26 }
  0x60   :  { %559 = vmatpush.msra.mxu0 %v2158_v28 }
  0x62   :  { %560 = vmatpush.msra.mxu0 %v65_v30 }
  0x7e   :  { %v2317_v56 = vpop.permute.xlu1 %40 }
  0x82   :  { %v2311_v46 = vpop.permute.xlu0 %30 }
  0x86   :  { %v2320_v63 = vpop.permute.xlu1 %45 }
  0x8a   :  { %v2314_v50 = vpop.permute.xlu0 %35 }
  0x9f   :  { %v118_v37 = vpop.f32.mrf.mxu1 }
  0xa0   :  { %v98_v40 = vpop.f32.mrf.mxu0 }
  0xa4   :  { %v138_v36 = vpop.f32.mrf.mxu2 }
  0xa5   :  { %165 = vmatpush.msra.mxu3 %v138_v36 }
  0xa7   :  { %166 = vmatpush.msra.mxu3 %v1946_v33 }
  0xa9   :  { %167 = vmatpush.msra.mxu3 %v118_v37 }
  0xab   :  { %168 = vmatpush.msra.mxu3 %v2184_v32 }
  0xad   :  { %169 = vmatpush.msra.mxu3 %v98_v40 }
  0xae   :  { %1711 = vmatmul.msk.f32.vlgmr.msra.gmra.mxu3 %vm141_vm0, %v2251_v41 }
  0xaf   :  { %299 = vmatpush.msrb.mxu3 %v1992_v2 }
  0xb1   :  { %300 = vmatpush.msrb.mxu3 %v2003_v4 }
  0xb3   :  { %301 = vmatpush.msrb.mxu3 %v2010_v5 }
  0xb5   :  { %302 = vmatpush.msrb.mxu3 %v2023_v7 }
  0xb6   :  { %1712 = vmatmul.msk.f32.gmra.mxu3 %vm141_vm0, %v2263_v43 }
  0xb7   :  { %303 = vmatpush.msrb.mxu3 %v2036_v9 }
  0xb9   :  { %304 = vmatpush.msrb.mxu3 %v2049_v11 }
  0xbb   :  { %305 = vmatpush.msrb.mxu3 %v2062_v13 }
  0xbd   :  { %306 = vmatpush.msrb.mxu3 %v2075_v15 }
  0xbe   :  { %1713 = vmatmul.msk.f32.gmra.mxu3 %vm141_vm0, %v2274_v44 }
  0xbf   :  { %307 = vmatpush.msrb.mxu3 %v2088_v17 }
  0xc1   :  { %308 = vmatpush.msrb.mxu3 %v2101_v19 }
  0xc3   :  { %309 = vmatpush.msrb.mxu3 %v2114_v21 }
  0xc5   :  { %310 = vmatpush.msrb.mxu3 %v2127_v23 }
  0xc6   :  { %1714 = vmatmul.msk.f32.gmra.mxu3 %vm141_vm0, %v2285_v45 }
  0xc7   :  { %311 = vmatpush.msrb.mxu3 %v2140_v25 }
  0xc9   :  { %312 = vmatpush.msrb.mxu3 %v2153_v27 }
  0xcb   :  { %313 = vmatpush.msrb.mxu3 %v2166_v29 }
  0xcd   :  { %314 = vmatpush.msrb.mxu3 %v2177_v31 }
  0xce   :  { %315 = vmatmul.f32.vlgmr.msrb.gmra.mxu3 %v2326_v14 }
  0xcf   :  { %525 = vmatpush.msra.mxu3 %v1992_v2 }
  0xd1   :  { %526 = vmatpush.msra.mxu3 %v2003_v4 }
  0xd3   :  { %527 = vmatpush.msra.mxu3 %v2010_v5 }
  0xd5   :  { %528 = vmatpush.msra.mxu3 %v2023_v7 }
  0xd7   :  { %529 = vmatpush.msra.mxu3 %v2036_v9 }
  0xd9   :  { %530 = vmatpush.msra.mxu3 %v2049_v11 }
  0xdb   :  { %531 = vmatpush.msra.mxu3 %v2062_v13 }
  0xdd   :  { %532 = vmatpush.msra.mxu3 %v2075_v15 }
  0xdf   :  { %533 = vmatpush.msra.mxu3 %v2088_v17 }
  0xe1   :  { %534 = vmatpush.msra.mxu3 %v2101_v19 }
  0xe3   :  { %535 = vmatpush.msra.mxu3 %v2114_v21 }
  0xe5   :  { %536 = vmatpush.msra.mxu3 %v2127_v23 }
  0xe7   :  { %537 = vmatpush.msra.mxu3 %v2140_v25 }
  0xe9   :  { %538 = vmatpush.msra.mxu3 %v2153_v27 }
  0xeb   :  { %539 = vmatpush.msra.mxu3 %v2166_v29 }
  0xed   :  { %540 = vmatpush.msra.mxu3 %v2177_v31 }
 0x131   :  { %v171_v47 = vpop.f32.mrf.mxu3 }
 0x132   :  { %v172_v48 = vadd.f32 %v171_v47, %v2311_v46 }
 0x134   :  { %v1715_v49 = vmul.f32 -1.442695, %v172_v48 }
 0x136   :  { %1798 = vpow2.f32 %v1715_v49 }
 0x139   :  { %v174_v51 = vpop.f32.mrf.mxu3 }
 0x13a   :  { %v175_v52 = vadd.f32 %v174_v51, %v2314_v50 }
 0x13c   :  { %v1799_v53 = vpop.eup %1798  ;;  %v1716_v54 = vmul.f32 -1.442695, %v175_v52 }
 0x13d   :  { %v195_v55 = vadd.f32 1.0, %v1799_v53 }
 0x13e   :  { %1800 = vpow2.f32 %v1716_v54 }
 0x13f   :  { %1802 = vrcp.f32 %v195_v55  ;;  %vm204_vm4 = vweird.f32 %v195_v55  ;;  %v208_v38 = vand.u32 2147483647, %v195_v55  ;;  %v210_v39 = vand.u32 2147483648, %v195_v55 }
 0x141   :  { %v177_v57 = vpop.f32.mrf.mxu3  ;;  %vm209_vm11 = vcmp.eq.f32.partialorder %v208_v38, 8.507059e+37 }
 0x142   :  { %v178_v58 = vadd.f32 %v177_v57, %v2317_v56 }
 0x144   :  { %v1801_v59 = vpop.eup %1800  ;;  %v1717_v60 = vmul.f32 -1.442695, %v178_v58 }
 0x145   :  { %v196_v61 = vadd.f32 1.0, %v1801_v59  ;;  %v1803_v62 = vpop.eup %1802 }
 0x146   :  { %1804 = vpow2.f32 %v1717_v60  ;;  %v200_v6 = vmul.f32 %v1803_v62, %v195_v55  ;;  %vm205_vm2 = vweird.f32 %v1803_v62  ;;  %v211_v55 = vor.u32 1.1754944e-38, %v210_v39 }
 0x147   :  { %1806 = vrcp.f32 %v196_v61  ;;  %v225_v34 = vand.u32 2147483648, %v196_v61  ;;  %vm219_vm3 = vweird.f32 %v196_v61  ;;  %v223_v36 = vand.u32 2147483647, %v196_v61  ;;  %vm2330_vm7 = vmor %vm204_vm4, %vm205_vm2 }
 0x148   :  { %v201_v18 = vsub.f32 1.0, %v200_v6 }
 0x149   :  { %v180_v0 = vpop.f32.mrf.mxu3  ;;  %v226_v51 = vor.u32 1.1754944e-38, %v225_v34  ;;  %vm224_vm8 = vcmp.eq.f32.partialorder %v223_v36, 8.507059e+37 }
 0x14a   :  { %v181_v1 = vadd.f32 %v180_v0, %v2320_v63  ;;  %v202_v26 = vmul.f32 %v1803_v62, %v201_v18 }
 0x14c   :  { %v1805_v3 = vpop.eup %1804  ;;  %v1718_v8 = vmul.f32 -1.442695, %v181_v1  ;;  %v203_v35 = vadd.f32 %v1803_v62, %v202_v26 }
 0x14d   :  { %v1807_v10 = vpop.eup %1806  ;;  %v197_v12 = vadd.f32 1.0, %v1805_v3 }
 0x14e   :  { %v215_v16 = vmul.f32 %v1807_v10, %v196_v61  ;;  %1808 = vpow2.f32 %v1718_v8  ;;  %vm220_vm1 = vweird.f32 %v1807_v10  ;;  %v207_v52 = vsel %vm2330_vm7, %v1803_v62, %v203_v35 }
 0x14f   :  { %1810 = vrcp.f32 %v197_v12  ;;  %vm221_vm5 = vmor %vm219_vm3, %vm220_vm1  ;;  %v240_v40 = vand.u32 2147483648, %v197_v12  ;;  %v238_v48 = vand.u32 2147483647, %v197_v12  ;;  %vm234_vm9 = vweird.f32 %v197_v12 }
 0x150   :  { %v216_v20 = vsub.f32 1.0, %v215_v16  ;;  %v212_v61 = vsel %vm209_vm11, %v211_v55, %v207_v52 }
 0x151   :  { %v241_v58 = vor.u32 1.1754944e-38, %v240_v40  ;;  %vm239_vm12 = vcmp.eq.f32.partialorder %v238_v48, 8.507059e+37 }
 0x152   :  { %v217_v22 = vmul.f32 %v1807_v10, %v216_v20 }
 0x154   :  { %v1809_v24 = vpop.eup %1808  ;;  %v218_v32 = vadd.f32 %v1807_v10, %v217_v22 }
 0x155   :  { %v1811_v28 = vpop.eup %1810  ;;  %v198_v30 = vadd.f32 1.0, %v1809_v24 }
 0x156   :  { %v230_v33 = vmul.f32 %v1811_v28, %v197_v12  ;;  %v222_v42 = vsel %vm221_vm5, %v1807_v10, %v218_v32  ;;  %vm235_vm6 = vweird.f32 %v1811_v28 }
 0x157   :  { %1812 = vrcp.f32 %v198_v30  ;;  %v227_v57 = vsel %vm224_vm8, %v226_v51, %v222_v42  ;;  %vm236_vm10 = vmor %vm234_vm9, %vm235_vm6  ;;  %v255_v12 = vand.u32 2147483648, %v198_v30  ;;  %vm249_vm14 = vweird.f32 %v198_v30 }
 0x158   :  { %v231_v37 = vsub.f32 1.0, %v230_v33  ;;  %v260_v6 = vmul.f32 %v227_v57, %v212_v61  ;;  %v253_v16 = vand.u32 2147483647, %v198_v30  ;;  %v316_v33 = vpop.f32.mrf.mxu3 }
 0x159   :  { %v256_v20 = vor.u32 1.1754944e-38, %v255_v12 }
 0x15a   :  { %v232_v47 = vmul.f32 %v1811_v28, %v231_v37  ;;  %vm254_vm1 = vcmp.eq.f32.partialorder %v253_v16, 8.507059e+37  ;;  %v2374_v37 = vld [vmem:[%s3245_s0 + $0x10] sm:$0xff] }
 0x15c   :  { %v233_v53 = vadd.f32 %v1811_v28, %v232_v47 }
 0x15d   :  { %v1813_v54 = vpop.eup %1812 }
 0x15e   :  { %v237_v59 = vsel %vm236_vm10, %v1811_v28, %v233_v53  ;;  %v245_v60 = vmul.f32 %v1813_v54, %v198_v30  ;;  %vm250_vm13 = vweird.f32 %v1813_v54 }
 0x15f   :  { %v242_v0 = vsel %vm239_vm12, %v241_v58, %v237_v59  ;;  %vm251_vm15 = vmor %vm249_vm14, %vm250_vm13 }
 0x160   :  { %v246_v1 = vsub.f32 1.0, %v245_v60  ;;  %v259_v3 = vmul.f32 0.0, %v242_v0 }
 0x162   :  { %v247_v8 = vmul.f32 %v1813_v54, %v246_v1  ;;  %v2336_v10 = vadd.f32 %v260_v6, %v259_v3  ;;  %v2541_v6 = vld [vmem:[%s3244_s3 + $0x28] sm:$0xff] }
 0x164   :  { %v248_v62 = vadd.f32 %v1813_v54, %v247_v8  ;;  %1814 = vtanh.f32 %v2336_v10 }
 0x166   :  { %v252_v18 = vsel %vm251_vm15, %v1813_v54, %v248_v62 }
 0x167   :  { %v257_v24 = vsel %vm254_vm1, %v256_v20, %v252_v18 }
 0x16a   :  { %v1815_v22 = vpop.eup %1814 }
 0x16b   :  { %v263_v26 = vmul.f32 %v1815_v22, %v257_v24 }
 0x16d   :  { %264 = vst [vmem:[%s3248_s5] sm:$0xff] %v263_v26  ;;  %335 = vmatmul.f32.vlgmr.msrb.gmra.mxu0 %v263_v26  ;;  %355 = vmatmul.f32.vlgmr.msrb.gmra.mxu1 %v263_v26 }
 0x1ea   :  { %v356_v28 = vpop.f32.mrf.mxu1  ;;  %v336_v32 = vpop.f32.mrf.mxu0 }
 0x1eb   :  { %370 = vmatpush.msrb.mxu2 %v356_v28 }
 0x1ed   :  { %371 = vmatpush.msrb.mxu2 %v263_v26 }
 0x1ef   :  { %372 = vmatpush.msrb.mxu2 %v336_v32 }
 0x1f1   :  { %373 = vmatpush.msrb.mxu2 %v2326_v14 }
 0x1f3   :  { %374 = vmatpush.msrb.mxu2 %v316_v33 }
 0x1f4   :  { %1720 = vmatmul.msk.f32.vlgmr.msrb.gmra.mxu2 %vm141_vm0, %v2251_v41 }
 0x1f5   :  { %505 = vmatpush.msra.mxu2 %v1992_v2 }
 0x1f7   :  { %506 = vmatpush.msra.mxu2 %v2003_v4 }
 0x1f9   :  { %507 = vmatpush.msra.mxu2 %v2010_v5 }
 0x1fb   :  { %508 = vmatpush.msra.mxu2 %v2023_v7 }
 0x1fc   :  { %1721 = vmatmul.msk.f32.gmra.mxu2 %vm141_vm0, %v2263_v43 }
 0x1fd   :  { %509 = vmatpush.msra.mxu2 %v2036_v9 }
 0x1ff   :  { %510 = vmatpush.msra.mxu2 %v2049_v11 }
 0x201   :  { %511 = vmatpush.msra.mxu2 %v2062_v13 }
 0x203   :  { %512 = vmatpush.msra.mxu2 %v2075_v15 }
 0x204   :  { %1722 = vmatmul.msk.f32.gmra.mxu2 %vm141_vm0, %v2274_v44 }
 0x205   :  { %513 = vmatpush.msra.mxu2 %v2088_v17 }
 0x207   :  { %514 = vmatpush.msra.mxu2 %v2101_v19 }
 0x209   :  { %515 = vmatpush.msra.mxu2 %v2114_v21 }
 0x20b   :  { %516 = vmatpush.msra.mxu2 %v2127_v23 }
 0x20c   :  { %1723 = vmatmul.msk.f32.gmra.mxu2 %vm141_vm0, %v2285_v45 }
 0x20d   :  { %517 = vmatpush.msra.mxu2 %v2140_v25 }
 0x20f   :  { %518 = vmatpush.msra.mxu2 %v2153_v27 }
 0x211   :  { %519 = vmatpush.msra.mxu2 %v2166_v29 }
 0x213   :  { %520 = vmatpush.msra.mxu2 %v2177_v31 }
 0x214   :  { %521 = vmatmul.f32.vlgmr.msra.gmra.mxu2 %v2374_v37 }
 0x277   :  { %v376_v2 = vpop.f32.mrf.mxu2 }
 0x278   :  { %v377_v4 = vadd.f32 %v376_v2, %v2311_v46 }
 0x27a   :  { %v1724_v5 = vmul.f32 -1.442695, %v377_v4 }
 0x27c   :  { %1816 = vpow2.f32 %v1724_v5 }
 0x27f   :  { %v379_v7 = vpop.f32.mrf.mxu2 }
 0x280   :  { %v380_v9 = vadd.f32 %v379_v7, %v2314_v50 }
 0x282   :  { %v1817_v11 = vpop.eup %1816  ;;  %v1725_v13 = vmul.f32 -1.442695, %v380_v9 }
 0x283   :  { %v400_v15 = vadd.f32 1.0, %v1817_v11 }
 0x284   :  { %1818 = vpow2.f32 %v1725_v13 }
 0x285   :  { %1820 = vrcp.f32 %v400_v15  ;;  %vm409_vm5 = vweird.f32 %v400_v15  ;;  %v413_v59 = vand.u32 2147483647, %v400_v15  ;;  %v415_v60 = vand.u32 2147483648, %v400_v15 }
 0x287   :  { %v382_v17 = vpop.f32.mrf.mxu2  ;;  %v416_v18 = vor.u32 1.1754944e-38, %v415_v60  ;;  %vm414_vm12 = vcmp.eq.f32.partialorder %v413_v59, 8.507059e+37  ;;  %v2506_v59 = vld [vmem:[%s3243_s4 + $0x40] sm:$0xff]  ;;  %v2515_v60 = vld [vmem:[%s3244_s3 + $0x38] sm:$0xff] }
 0x288   :  { %v383_v19 = vadd.f32 %v382_v17, %v2317_v56 }
 0x28a   :  { %v1819_v21 = vpop.eup %1818  ;;  %v1726_v23 = vmul.f32 -1.442695, %v383_v19 }
 0x28b   :  { %v401_v25 = vadd.f32 1.0, %v1819_v21  ;;  %v1821_v27 = vpop.eup %1820 }
 0x28c   :  { %1822 = vpow2.f32 %v1726_v23  ;;  %v405_v30 = vmul.f32 %v1821_v27, %v400_v15  ;;  %vm410_vm3 = vweird.f32 %v1821_v27 }
 0x28d   :  { %1824 = vrcp.f32 %v401_v25  ;;  %v430_v54 = vand.u32 2147483648, %v401_v25  ;;  %vm424_vm4 = vweird.f32 %v401_v25  ;;  %v428_v57 = vand.u32 2147483647, %v401_v25  ;;  %vm2378_vm8 = vmor %vm409_vm5, %vm410_vm3 }
 0x28e   :  { %v406_v39 = vsub.f32 1.0, %v405_v30  ;;  %v2420_v30 = vld [vmem:[%s3243_s4 + $0x70] sm:$0xff] }
 0x28f   :  { %v385_v29 = vpop.f32.mrf.mxu2  ;;  %v431_v8 = vor.u32 1.1754944e-38, %v430_v54  ;;  %vm429_vm9 = vcmp.eq.f32.partialorder %v428_v57, 8.507059e+37  ;;  %v2492_v54 = vld [vmem:[%s3243_s4 + $0x48] sm:$0xff] }
 0x290   :  { %v386_v31 = vadd.f32 %v385_v29, %v2320_v63  ;;  %v407_v48 = vmul.f32 %v1821_v27, %v406_v39  ;;  %v2403_v29 = vld [vmem:[%s3244_s3 + $0x78] sm:$0xff]  ;;  %v2444_v39 = vld [vmem:[%s3244_s3 + $0x60] sm:$0xff] }
 0x291   :  { %731 = vmatpush.msrb.mxu2 %v2403_v29  ;;  %917 = vmatpush.msrb.mxu0 %v2403_v29 }
 0x292   :  { %v1823_v14 = vpop.eup %1822  ;;  %v1727_v34 = vmul.f32 -1.442695, %v386_v31  ;;  %v408_v55 = vadd.f32 %v1821_v27, %v407_v48  ;;  %v2408_v31 = vld [vmem:[%s3243_s4 + $0x78] sm:$0xff]  ;;  %v2472_v48 = vld [vmem:[%s3244_s3 + $0x50] sm:$0xff] }
 0x293   :  { %v1825_v35 = vpop.eup %1824  ;;  %v402_v36 = vadd.f32 1.0, %v1823_v14  ;;  %751 = vmatpush.msrb.mxu3 %v2408_v31  ;;  %v2415_v14 = vld [vmem:[%s3244_s3 + $0x70] sm:$0xff] }
 0x294   :  { %v420_v38 = vmul.f32 %v1825_v35, %v401_v25  ;;  %1826 = vpow2.f32 %v1727_v34  ;;  %vm425_vm2 = vweird.f32 %v1825_v35  ;;  %v412_v62 = vsel %vm2378_vm8, %v1821_v27, %v408_v55  ;;  %732 = vmatpush.msrb.mxu2 %v2415_v14  ;;  %918 = vmatpush.msrb.mxu0 %v2415_v14 }
 0x295   :  { %1828 = vrcp.f32 %v402_v36  ;;  %vm426_vm6 = vmor %vm424_vm4, %vm425_vm2  ;;  %v445_v61 = vand.u32 2147483648, %v402_v36  ;;  %v443_v3 = vand.u32 2147483647, %v402_v36  ;;  %vm439_vm10 = vweird.f32 %v402_v36  ;;  %752 = vmatpush.msrb.mxu3 %v2420_v30 }
 0x296   :  { %v421_v40 = vsub.f32 1.0, %v420_v38  ;;  %v417_v28 = vsel %vm414_vm12, %v416_v18, %v412_v62  ;;  %v2550_v62 = vld [vmem:[%s3243_s4 + $0x28] sm:$0xff]  ;;  %v2561_v18 = vld [vmem:[%s3243_s4 + $0x20] sm:$0xff] }
 0x297   :  { %v446_v22 = vor.u32 1.1754944e-38, %v445_v61  ;;  %vm444_vm13 = vcmp.eq.f32.partialorder %v443_v3, 8.507059e+37  ;;  %v522_v27 = vpop.f32.mrf.mxu2  ;;  %v2520_v61 = vld [vmem:[%s3243_s4 + $0x38] sm:$0xff]  ;;  %v2536_v3 = vld [vmem:[%s3243_s4 + $0x30] sm:$0xff] }
 0x298   :  { %v422_v42 = vmul.f32 %v1825_v35, %v421_v40  ;;  %v2449_v40 = vld [vmem:[%s3243_s4 + $0x60] sm:$0xff] }
 0x29a   :  { %v1827_v47 = vpop.eup %1826  ;;  %v423_v52 = vadd.f32 %v1825_v35, %v422_v42  ;;  %v2458_v42 = vld [vmem:[%s3244_s3 + $0x58] sm:$0xff] }
 0x29b   :  { %v1829_v49 = vpop.eup %1828  ;;  %v403_v51 = vadd.f32 1.0, %v1827_v47  ;;  %v2463_v47 = vld [vmem:[%s3243_s4 + $0x58] sm:$0xff] }
 0x29c   :  { %v435_v53 = vmul.f32 %v1829_v49, %v402_v36  ;;  %v427_v0 = vsel %vm426_vm6, %v1825_v35, %v423_v52  ;;  %vm440_vm7 = vweird.f32 %v1829_v49  ;;  %v2430_v36 = vld [vmem:[%s3244_s3 + $0x68] sm:$0xff] }
 0x29d   :  { %1830 = vrcp.f32 %v403_v51  ;;  %v432_v20 = vsel %vm429_vm9, %v431_v8, %v427_v0  ;;  %vm441_vm11 = vmor %vm439_vm10, %vm440_vm7  ;;  %v460_v11 = vand.u32 2147483648, %v403_v51  ;;  %vm454_vm15 = vweird.f32 %v403_v51  ;;  %733 = vmatpush.msrb.mxu2 %v2430_v36  ;;  %919 = vmatpush.msrb.mxu0 %v2430_v36 }
 0x29e   :  { %v436_v58 = vsub.f32 1.0, %v435_v53  ;;  %v465_v4 = vmul.f32 %v432_v20, %v417_v28  ;;  %v458_v13 = vand.u32 2147483647, %v403_v51  ;;  %v2487_v53 = vld [vmem:[%s3244_s3 + $0x48] sm:$0xff] }
 0x29f   :  { %v461_v17 = vor.u32 1.1754944e-38, %v460_v11  ;;  %734 = vmatpush.msrb.mxu2 %v2444_v39  ;;  %920 = vmatpush.msrb.mxu0 %v2444_v39 }
 0x2a0   :  { %v437_v1 = vmul.f32 %v1829_v49, %v436_v58  ;;  %vm459_vm2 = vcmp.eq.f32.partialorder %v458_v13, 8.507059e+37  ;;  %v2501_v58 = vld [vmem:[%s3244_s3 + $0x40] sm:$0xff] }
 0x2a1   :  { %735 = vmatpush.msrb.mxu2 %v2458_v42  ;;  %921 = vmatpush.msrb.mxu0 %v2458_v42  ;;  %v2619_v13 = vld [vmem:[%s3244_s3] sm:$0xff] }
 0x2a2   :  { %v438_v12 = vadd.f32 %v1829_v49, %v437_v1  ;;  %v2531_v1 = vld [vmem:[%s3244_s3 + $0x30] sm:$0xff] }
 0x2a3   :  { %v1831_v16 = vpop.eup %1830  ;;  %736 = vmatpush.msrb.mxu2 %v2472_v48  ;;  %922 = vmatpush.msrb.mxu0 %v2472_v48 }
 0x2a4   :  { %v442_v24 = vsel %vm441_vm11, %v1829_v49, %v438_v12  ;;  %v450_v26 = vmul.f32 %v1831_v16, %v403_v51  ;;  %vm455_vm14 = vweird.f32 %v1831_v16  ;;  %v2477_v49 = vld [vmem:[%s3243_s4 + $0x50] sm:$0xff] }
 0x2a5   :  { %v447_v32 = vsel %vm444_vm13, %v446_v22, %v442_v24  ;;  %vm456_vm1 = vmor %vm454_vm15, %vm455_vm14  ;;  %737 = vmatpush.msrb.mxu2 %v2487_v53  ;;  %923 = vmatpush.msrb.mxu0 %v2487_v53  ;;  %v2571_v24 = vld [vmem:[%s3244_s3 + $0x18] sm:$0xff] }
 0x2a6   :  { %v451_v33 = vsub.f32 1.0, %v450_v26  ;;  %v464_v2 = vmul.f32 %v447_v32, %v2336_v10  ;;  %v2576_v26 = vld [vmem:[%s3243_s4 + $0x18] sm:$0xff]  ;;  %v2587_v32 = vld [vmem:[%s3244_s3 + $0x10] sm:$0xff] }
 0x2a7   :  { %738 = vmatpush.msrb.mxu2 %v2501_v58  ;;  %924 = vmatpush.msrb.mxu0 %v2501_v58 }
 0x2a8   :  { %v452_v5 = vmul.f32 %v1831_v16, %v451_v33  ;;  %v2385_v7 = vadd.f32 %v465_v4, %v464_v2  ;;  %v2592_v33 = vld [vmem:[%s3243_s4 + $0x10] sm:$0xff]  ;;  %v2602_v2 = vld [vmem:[%s3244_s3 + $0x8] sm:$0xff] }
 0x2a9   :  { %739 = vmatpush.msrb.mxu2 %v2515_v60  ;;  %925 = vmatpush.msrb.mxu0 %v2515_v60  ;;  %v2607_v4 = vld [vmem:[%s3243_s4 + $0x8] sm:$0xff] }
 0x2aa   :  { %v453_v9 = vadd.f32 %v1831_v16, %v452_v5  ;;  %1832 = vtanh.f32 %v2385_v7 }
 0x2ab   :  { %740 = vmatpush.msrb.mxu2 %v2531_v1  ;;  %926 = vmatpush.msrb.mxu0 %v2531_v1 }
 0x2ac   :  { %v457_v15 = vsel %vm456_vm1, %v1831_v16, %v453_v9  ;;  %v2556_v16 = vld [vmem:[%s3244_s3 + $0x20] sm:$0xff] }
 0x2ad   :  { %v462_v21 = vsel %vm459_vm2, %v461_v17, %v457_v15  ;;  %741 = vmatpush.msrb.mxu2 %v2541_v6  ;;  %927 = vmatpush.msrb.mxu0 %v2541_v6  ;;  %v2624_v15 = vld [vmem:[%s3243_s4] sm:$0xff] }
 0x2af   :  { %742 = vmatpush.msrb.mxu2 %v2556_v16  ;;  %928 = vmatpush.msrb.mxu0 %v2556_v16 }
 0x2b0   :  { %v1833_v19 = vpop.eup %1832 }
 0x2b1   :  { %v468_v23 = vmul.f32 %v1833_v19, %v462_v21  ;;  %743 = vmatpush.msrb.mxu2 %v2571_v24  ;;  %929 = vmatpush.msrb.mxu0 %v2571_v24 }
 0x2b3   :  { %1728 = vst [vmem:[%s3248_s5 + $0x8] sm:$0xff] %v468_v23  ;;  %541 = vmatmul.f32.vlgmr.msra.gmra.mxu3 %v468_v23  ;;  %561 = vmatmul.f32.vlgmr.msra.gmra.mxu0 %v468_v23 }
 0x2b4   :  { %744 = vmatpush.msrb.mxu2 %v2587_v32  ;;  %930 = vmatpush.msrb.mxu0 %v2587_v32 }
 0x2b6   :  { %745 = vmatpush.msrb.mxu2 %v2602_v2  ;;  %931 = vmatpush.msrb.mxu0 %v2602_v2 }
 0x2b8   :  { %746 = vmatpush.msrb.mxu2 %v2619_v13  ;;  %932 = vmatpush.msrb.mxu0 %v2619_v13 }
 0x2ba   :  { %957 = vmatpush.msra.mxu2 %v2408_v31  ;;  %1143 = vmatpush.msra.mxu0 %v2403_v29 }
 0x2bc   :  { %958 = vmatpush.msra.mxu2 %v2420_v30  ;;  %1144 = vmatpush.msra.mxu0 %v2415_v14 }
 0x2be   :  { %1145 = vmatpush.msra.mxu0 %v2430_v36 }
 0x2c0   :  { %1146 = vmatpush.msra.mxu0 %v2444_v39 }
 0x2c2   :  { %1147 = vmatpush.msra.mxu0 %v2458_v42 }
 0x2c4   :  { %1148 = vmatpush.msra.mxu0 %v2472_v48 }
 0x2c6   :  { %1149 = vmatpush.msra.mxu0 %v2487_v53 }
 0x2c8   :  { %1150 = vmatpush.msra.mxu0 %v2501_v58 }
 0x2ca   :  { %1151 = vmatpush.msra.mxu0 %v2515_v60 }
 0x2cc   :  { %1152 = vmatpush.msra.mxu0 %v2531_v1 }
 0x2ce   :  { %1153 = vmatpush.msra.mxu0 %v2541_v6 }
 0x2d0   :  { %1154 = vmatpush.msra.mxu0 %v2556_v16 }
 0x2d2   :  { %1155 = vmatpush.msra.mxu0 %v2571_v24 }
 0x2d4   :  { %1156 = vmatpush.msra.mxu0 %v2587_v32 }
 0x2d6   :  { %1157 = vmatpush.msra.mxu0 %v2602_v2 }
 0x2d8   :  { %1158 = vmatpush.msra.mxu0 %v2619_v13 }
 0x330   :  { %v562_v10 = vpop.f32.mrf.mxu0 }
 0x331   :  { %576 = vmatpush.msra.mxu1 %v562_v10 }
 0x333   :  { %577 = vmatpush.msra.mxu1 %v468_v23 }
 0x336   :  { %v542_v25 = vpop.f32.mrf.mxu3 }
 0x337   :  { %578 = vmatpush.msra.mxu1 %v542_v25  ;;  %v2641_v25 = vld [vmem:[%s3245_s0 + $0x18] sm:$0xff] }
 0x339   :  { %579 = vmatpush.msra.mxu1 %v2374_v37  ;;  %v2435_v37 = vld [vmem:[%s3243_s4 + $0x68] sm:$0xff] }
 0x33a   :  { %753 = vmatpush.msrb.mxu3 %v2435_v37  ;;  %959 = vmatpush.msra.mxu2 %v2435_v37 }
 0x33b   :  { %580 = vmatpush.msra.mxu1 %v522_v27 }
 0x33c   :  { %1730 = vmatmul.msk.f32.vlgmr.msra.gmra.mxu1 %vm141_vm0, %v2251_v41  ;;  %754 = vmatpush.msrb.mxu3 %v2449_v40 }
 0x33d   :  { %711 = vmatpush.msrb.mxu1 %v2403_v29  ;;  %960 = vmatpush.msra.mxu2 %v2449_v40 }
 0x33e   :  { %755 = vmatpush.msrb.mxu3 %v2463_v47 }
 0x33f   :  { %712 = vmatpush.msrb.mxu1 %v2415_v14  ;;  %961 = vmatpush.msra.mxu2 %v2463_v47 }
 0x340   :  { %756 = vmatpush.msrb.mxu3 %v2477_v49 }
 0x341   :  { %713 = vmatpush.msrb.mxu1 %v2430_v36  ;;  %962 = vmatpush.msra.mxu2 %v2477_v49 }
 0x342   :  { %757 = vmatpush.msrb.mxu3 %v2492_v54 }
 0x343   :  { %714 = vmatpush.msrb.mxu1 %v2444_v39  ;;  %963 = vmatpush.msra.mxu2 %v2492_v54 }
 0x344   :  { %1731 = vmatmul.msk.f32.gmra.mxu1 %vm141_vm0, %v2263_v43  ;;  %758 = vmatpush.msrb.mxu3 %v2506_v59 }
 0x345   :  { %715 = vmatpush.msrb.mxu1 %v2458_v42  ;;  %964 = vmatpush.msra.mxu2 %v2506_v59 }
 0x346   :  { %759 = vmatpush.msrb.mxu3 %v2520_v61 }
 0x347   :  { %716 = vmatpush.msrb.mxu1 %v2472_v48  ;;  %965 = vmatpush.msra.mxu2 %v2520_v61 }
 0x348   :  { %760 = vmatpush.msrb.mxu3 %v2536_v3 }
 0x349   :  { %717 = vmatpush.msrb.mxu1 %v2487_v53  ;;  %966 = vmatpush.msra.mxu2 %v2536_v3 }
 0x34a   :  { %761 = vmatpush.msrb.mxu3 %v2550_v62 }
 0x34b   :  { %718 = vmatpush.msrb.mxu1 %v2501_v58  ;;  %967 = vmatpush.msra.mxu2 %v2550_v62 }
 0x34c   :  { %1732 = vmatmul.msk.f32.gmra.mxu1 %vm141_vm0, %v2274_v44  ;;  %762 = vmatpush.msrb.mxu3 %v2561_v18 }
 0x34d   :  { %719 = vmatpush.msrb.mxu1 %v2515_v60  ;;  %968 = vmatpush.msra.mxu2 %v2561_v18 }
 0x34e   :  { %763 = vmatpush.msrb.mxu3 %v2576_v26 }
 0x34f   :  { %720 = vmatpush.msrb.mxu1 %v2531_v1  ;;  %969 = vmatpush.msra.mxu2 %v2576_v26 }
 0x350   :  { %764 = vmatpush.msrb.mxu3 %v2592_v33 }
 0x351   :  { %721 = vmatpush.msrb.mxu1 %v2541_v6  ;;  %970 = vmatpush.msra.mxu2 %v2592_v33 }
 0x352   :  { %765 = vmatpush.msrb.mxu3 %v2607_v4 }
 0x353   :  { %722 = vmatpush.msrb.mxu1 %v2556_v16  ;;  %971 = vmatpush.msra.mxu2 %v2607_v4 }
 0x354   :  { %1733 = vmatmul.msk.f32.gmra.mxu1 %vm141_vm0, %v2285_v45  ;;  %766 = vmatpush.msrb.mxu3 %v2624_v15 }
 0x355   :  { %723 = vmatpush.msrb.mxu1 %v2571_v24  ;;  %972 = vmatpush.msra.mxu2 %v2624_v15 }
 0x357   :  { %724 = vmatpush.msrb.mxu1 %v2587_v32 }
 0x359   :  { %725 = vmatpush.msrb.mxu1 %v2602_v2 }
 0x35b   :  { %726 = vmatpush.msrb.mxu1 %v2619_v13 }
 0x35c   :  { %727 = vmatmul.f32.vlgmr.msrb.gmra.mxu1 %v2641_v25 }
 0x3b9   :  { %v582_v34 = vpop.f32.mrf.mxu1 }
 0x3ba   :  { %v583_v35 = vadd.f32 %v582_v34, %v2311_v46 }
 0x3bc   :  { %v1734_v38 = vmul.f32 -1.442695, %v583_v35 }
 0x3be   :  { %1834 = vpow2.f32 %v1734_v38 }
 0x3c1   :  { %v585_v51 = vpop.f32.mrf.mxu1 }
 0x3c2   :  { %v586_v52 = vadd.f32 %v585_v51, %v2314_v50 }
 0x3c4   :  { %v1835_v55 = vpop.eup %1834  ;;  %v1735_v57 = vmul.f32 -1.442695, %v586_v52 }
 0x3c5   :  { %v2524_v0 = vadd.f32 1.0, %v1835_v55 }
 0x3c6   :  { %1836 = vpow2.f32 %v1735_v57 }
 0x3c7   :  { %1838 = vrcp.f32 %v2524_v0  ;;  %vm615_vm6 = vweird.f32 %v2524_v0 }
 0x3c9   :  { %v588_v8 = vpop.f32.mrf.mxu1 }
 0x3ca   :  { %v589_v12 = vadd.f32 %v588_v8, %v2317_v56 }
 0x3cc   :  { %v1837_v20 = vpop.eup %1836  ;;  %v1736_v22 = vmul.f32 -1.442695, %v589_v12 }
 0x3cd   :  { %v2580_v28 = vadd.f32 1.0, %v1837_v20  ;;  %v2611_v5 = vpop.eup %1838 }
 0x3ce   :  { %1840 = vpow2.f32 %v1736_v22  ;;  %v611_v19 = vmul.f32 %v2611_v5, %v2524_v0  ;;  %vm616_vm4 = vweird.f32 %v2611_v5 }
 0x3cf   :  { %1842 = vrcp.f32 %v2580_v28  ;;  %v636_v20 = vand.u32 2147483648, %v2580_v28  ;;  %vm630_vm5 = vweird.f32 %v2580_v28  ;;  %vm2685_vm9 = vmor %vm615_vm6, %vm616_vm4 }
 0x3d0   :  { %v612_v34 = vsub.f32 1.0, %v611_v19  ;;  %v621_v19 = vand.u32 2147483648, %v2524_v0 }
 0x3d1   :  { %v591_v9 = vpop.f32.mrf.mxu1 }
 0x3d2   :  { %v592_v11 = vadd.f32 %v591_v9, %v2320_v63  ;;  %v613_v52 = vmul.f32 %v2611_v5, %v612_v34  ;;  %v634_v9 = vand.u32 2147483647, %v2580_v28 }
 0x3d4   :  { %v1841_v17 = vpop.eup %1840  ;;  %v1737_v21 = vmul.f32 -1.442695, %v592_v11  ;;  %v614_v22 = vadd.f32 %v2611_v5, %v613_v52  ;;  %vm635_vm10 = vcmp.eq.f32.partialorder %v634_v9, 8.507059e+37 }
 0x3d5   :  { %v1843_v23 = vpop.eup %1842  ;;  %v2634_v10 = vadd.f32 1.0, %v1841_v17  ;;  %v619_v17 = vand.u32 2147483647, %v2524_v0 }
 0x3d6   :  { %v626_v27 = vmul.f32 %v1843_v23, %v2580_v28  ;;  %1844 = vpow2.f32 %v1737_v21  ;;  %vm631_vm3 = vweird.f32 %v1843_v23 }
 0x3d7   :  { %1846 = vrcp.f32 %v2634_v10  ;;  %vm2673_vm7 = vmor %vm630_vm5, %vm631_vm3  ;;  %vm645_vm11 = vweird.f32 %v2634_v10  ;;  %vm620_vm13 = vcmp.eq.f32.partialorder %v619_v17, 8.507059e+37 }
 0x3d8   :  { %v627_v35 = vsub.f32 1.0, %v626_v27  ;;  %v651_v27 = vand.u32 2147483648, %v2634_v10 }
 0x3da   :  { %v628_v38 = vmul.f32 %v1843_v23, %v627_v35  ;;  %v649_v35 = vand.u32 2147483647, %v2634_v10 }
 0x3dc   :  { %v1845_v51 = vpop.eup %1844  ;;  %v629_v8 = vadd.f32 %v1843_v23, %v628_v38  ;;  %v637_v38 = vor.u32 1.1754944e-38, %v636_v20  ;;  %vm650_vm14 = vcmp.eq.f32.partialorder %v649_v35, 8.507059e+37 }
 0x3dd   :  { %v1847_v55 = vpop.eup %1846  ;;  %v2656_v57 = vadd.f32 1.0, %v1845_v51  ;;  %v618_v51 = vsel %vm2685_vm9, %v2611_v5, %v614_v22 }
 0x3de   :  { %v641_v12 = vmul.f32 %v1847_v55, %v2634_v10  ;;  %v633_v28 = vsel %vm2673_vm7, %v1843_v23, %v629_v8  ;;  %vm646_vm8 = vweird.f32 %v1847_v55  ;;  %v622_v8 = vor.u32 1.1754944e-38, %v621_v19 }
 0x3df   :  { %1848 = vrcp.f32 %v2656_v57  ;;  %vm647_vm12 = vmor %vm645_vm11, %vm646_vm8  ;;  %vm660_vm1 = vweird.f32 %v2656_v57 }
 0x3e0   :  { %v642_v11 = vsub.f32 1.0, %v641_v12  ;;  %v638_v12 = vsel %vm635_vm10, %v637_v38, %v633_v28  ;;  %v623_v5 = vsel %vm620_vm13, %v622_v8, %v618_v51  ;;  %v2772_v8 = vld [vmem:[%s3245_s0 + $0x20] sm:$0xff] }
 0x3e1   :  { %933 = vmatmul.f32.vlgmr.msrb.gmra.mxu0 %v2772_v8 }
 0x3e2   :  { %v643_v34 = vmul.f32 %v1847_v55, %v642_v11  ;;  %v652_v11 = vor.u32 1.1754944e-38, %v651_v27  ;;  %v666_v27 = vand.u32 2147483648, %v2656_v57 }
 0x3e4   :  { %v644_v23 = vadd.f32 %v1847_v55, %v643_v34  ;;  %v671_v34 = vmul.f32 %v638_v12, %v623_v5  ;;  %v667_v35 = vor.u32 1.1754944e-38, %v666_v27 }
 0x3e5   :  { %v1849_v52 = vpop.eup %1848 }
 0x3e6   :  { %v648_v20 = vsel %vm647_vm12, %v1847_v55, %v644_v23  ;;  %v656_v21 = vmul.f32 %v1849_v52, %v2656_v57  ;;  %vm661_vm15 = vweird.f32 %v1849_v52 }
 0x3e7   :  { %v653_v10 = vsel %vm650_vm14, %v652_v11, %v648_v20  ;;  %vm662_vm2 = vmor %vm660_vm1, %vm661_vm15 }
 0x3e8   :  { %v657_v22 = vsub.f32 1.0, %v656_v21  ;;  %v670_v9 = vmul.f32 %v653_v10, %v2385_v7  ;;  %v664_v7 = vand.u32 2147483647, %v2656_v57 }
 0x3ea   :  { %v658_v19 = vmul.f32 %v1849_v52, %v657_v22  ;;  %v2702_v17 = vadd.f32 %v671_v34, %v670_v9  ;;  %vm665_vm3 = vcmp.eq.f32.partialorder %v664_v7, 8.507059e+37 }
 0x3ec   :  { %v659_v55 = vadd.f32 %v1849_v52, %v658_v19  ;;  %1850 = vtanh.f32 %v2702_v17 }
 0x3ee   :  { %v663_v28 = vsel %vm662_vm2, %v1849_v52, %v659_v55  ;;  %v728_v52 = vpop.f32.mrf.mxu1 }
 0x3ef   :  { %v668_v38 = vsel %vm665_vm3, %v667_v35, %v663_v28 }
 0x3f2   :  { %v1851_v0 = vpop.eup %1850 }
 0x3f3   :  { %v674_v51 = vmul.f32 %v1851_v0, %v668_v38 }
 0x3f5   :  { %1738 = vst [vmem:[%s3248_s5 + $0x10] sm:$0xff] %v674_v51  ;;  %747 = vmatmul.f32.vlgmr.msrb.gmra.mxu2 %v674_v51  ;;  %767 = vmatmul.f32.vlgmr.msrb.gmra.mxu3 %v674_v51 }
 0x478   :  { %v768_v57 = vpop.f32.mrf.mxu3  ;;  %v748_v23 = vpop.f32.mrf.mxu2 }
 0x479   :  { %782 = vmatpush.msra.mxu1 %v768_v57 }
 0x47b   :  { %783 = vmatpush.msra.mxu1 %v674_v51 }
 0x47d   :  { %784 = vmatpush.msra.mxu1 %v748_v23 }
 0x47f   :  { %785 = vmatpush.msra.mxu1 %v2641_v25 }
 0x481   :  { %786 = vmatpush.msra.mxu1 %v728_v52 }
 0x482   :  { %1740 = vmatmul.msk.f32.vlgmr.msra.gmra.mxu1 %vm141_vm0, %v2251_v41 }
 0x483   :  { %937 = vmatpush.msrb.mxu1 %v2403_v29 }
 0x485   :  { %938 = vmatpush.msrb.mxu1 %v2415_v14 }
 0x487   :  { %939 = vmatpush.msrb.mxu1 %v2430_v36 }
 0x489   :  { %940 = vmatpush.msrb.mxu1 %v2444_v39 }
 0x48a   :  { %1741 = vmatmul.msk.f32.gmra.mxu1 %vm141_vm0, %v2263_v43 }
 0x48b   :  { %941 = vmatpush.msrb.mxu1 %v2458_v42 }
 0x48d   :  { %942 = vmatpush.msrb.mxu1 %v2472_v48 }
 0x48f   :  { %943 = vmatpush.msrb.mxu1 %v2487_v53 }
 0x491   :  { %944 = vmatpush.msrb.mxu1 %v2501_v58 }
 0x492   :  { %1742 = vmatmul.msk.f32.gmra.mxu1 %vm141_vm0, %v2274_v44 }
 0x493   :  { %945 = vmatpush.msrb.mxu1 %v2515_v60 }
 0x495   :  { %946 = vmatpush.msrb.mxu1 %v2531_v1 }
 0x497   :  { %947 = vmatpush.msrb.mxu1 %v2541_v6 }
 0x499   :  { %948 = vmatpush.msrb.mxu1 %v2556_v16 }
 0x49a   :  { %1743 = vmatmul.msk.f32.gmra.mxu1 %vm141_vm0, %v2285_v45 }
 0x49b   :  { %949 = vmatpush.msrb.mxu1 %v2571_v24 }
 0x49d   :  { %950 = vmatpush.msrb.mxu1 %v2587_v32 }
 0x49f   :  { %951 = vmatpush.msrb.mxu1 %v2602_v2 }
 0x4a1   :  { %952 = vmatpush.msrb.mxu1 %v2619_v13 }
 0x4a3   :  { %1163 = vmatpush.msra.mxu1 %v2408_v31 }
 0x4a5   :  { %1164 = vmatpush.msra.mxu1 %v2420_v30 }
 0x4a7   :  { %1165 = vmatpush.msra.mxu1 %v2435_v37 }
 0x4a9   :  { %1166 = vmatpush.msra.mxu1 %v2449_v40 }
 0x4ab   :  { %1167 = vmatpush.msra.mxu1 %v2463_v47 }
 0x4ad   :  { %1168 = vmatpush.msra.mxu1 %v2477_v49 }
 0x4af   :  { %1169 = vmatpush.msra.mxu1 %v2492_v54 }
 0x4b1   :  { %1170 = vmatpush.msra.mxu1 %v2506_v59 }
 0x4b3   :  { %1171 = vmatpush.msra.mxu1 %v2520_v61 }
 0x4b5   :  { %1172 = vmatpush.msra.mxu1 %v2536_v3 }
 0x4b7   :  { %1173 = vmatpush.msra.mxu1 %v2550_v62 }
 0x4b9   :  { %1174 = vmatpush.msra.mxu1 %v2561_v18 }
 0x4bb   :  { %1175 = vmatpush.msra.mxu1 %v2576_v26 }
 0x4bd   :  { %1176 = vmatpush.msra.mxu1 %v2592_v33 }
 0x4bf   :  { %1177 = vmatpush.msra.mxu1 %v2607_v4 }
 0x4c1   :  { %1178 = vmatpush.msra.mxu1 %v2624_v15 }
 0x4ff   :  { %v788_v41 = vpop.f32.mrf.mxu1 }
 0x500   :  { %v789_v43 = vadd.f32 %v788_v41, %v2311_v46 }
 0x502   :  { %v1744_v44 = vmul.f32 -1.442695, %v789_v43 }
 0x504   :  { %1852 = vpow2.f32 %v1744_v44 }
 0x507   :  { %v791_v45 = vpop.f32.mrf.mxu1 }
 0x508   :  { %v792_v31 = vadd.f32 %v791_v45, %v2314_v50 }
 0x50a   :  { %v1853_v30 = vpop.eup %1852  ;;  %v1745_v37 = vmul.f32 -1.442695, %v792_v31 }
 0x50b   :  { %v812_v40 = vadd.f32 1.0, %v1853_v30 }
 0x50c   :  { %1854 = vpow2.f32 %v1745_v37 }
 0x50d   :  { %1856 = vrcp.f32 %v812_v40  ;;  %vm821_vm7 = vweird.f32 %v812_v40  ;;  %v825_v35 = vand.u32 2147483647, %v812_v40  ;;  %v827_v0 = vand.u32 2147483648, %v812_v40 }
 0x50f   :  { %v794_v47 = vpop.f32.mrf.mxu1  ;;  %v828_v31 = vor.u32 1.1754944e-38, %v827_v0  ;;  %vm826_vm14 = vcmp.eq.f32.partialorder %v825_v35, 8.507059e+37 }
 0x510   :  { %v795_v49 = vadd.f32 %v794_v47, %v2317_v56 }
 0x512   :  { %v1855_v54 = vpop.eup %1854  ;;  %v1746_v59 = vmul.f32 -1.442695, %v795_v49 }
 0x513   :  { %v813_v61 = vadd.f32 1.0, %v1855_v54  ;;  %v1857_v3 = vpop.eup %1856 }
 0x514   :  { %1858 = vpow2.f32 %v1746_v59  ;;  %v817_v33 = vmul.f32 %v1857_v3, %v812_v40  ;;  %vm822_vm5 = vweird.f32 %v1857_v3 }
 0x515   :  { %1860 = vrcp.f32 %v813_v61  ;;  %v842_v55 = vand.u32 2147483648, %v813_v61  ;;  %vm836_vm6 = vweird.f32 %v813_v61  ;;  %v840_v7 = vand.u32 2147483647, %v813_v61  ;;  %vm2776_vm10 = vmor %vm821_vm7, %vm822_vm5 }
 0x516   :  { %v818_v11 = vsub.f32 1.0, %v817_v33 }
 0x517   :  { %v797_v62 = vpop.f32.mrf.mxu1  ;;  %v843_v41 = vor.u32 1.1754944e-38, %v842_v55  ;;  %vm841_vm11 = vcmp.eq.f32.partialorder %v840_v7, 8.507059e+37 }
 0x518   :  { %v798_v18 = vadd.f32 %v797_v62, %v2320_v63  ;;  %v819_v10 = vmul.f32 %v1857_v3, %v818_v11 }
 0x51a   :  { %v1859_v26 = vpop.eup %1858  ;;  %v1747_v4 = vmul.f32 -1.442695, %v798_v18  ;;  %v820_v27 = vadd.f32 %v1857_v3, %v819_v10  ;;  %v2793_v10 = vld [vmem:[%s3247_s1] sm:$0xff] }
 0x51b   :  { %v1861_v15 = vpop.eup %1860  ;;  %v814_v25 = vadd.f32 1.0, %v1859_v26 }
 0x51c   :  { %v832_v12 = vmul.f32 %v1861_v15, %v813_v61  ;;  %1862 = vpow2.f32 %v1747_v4  ;;  %vm837_vm4 = vweird.f32 %v1861_v15  ;;  %v824_v43 = vsel %vm2776_vm10, %v1857_v3, %v820_v27 }
 0x51d   :  { %1864 = vrcp.f32 %v814_v25  ;;  %vm838_vm8 = vmor %vm836_vm6, %vm837_vm4  ;;  %v857_v38 = vand.u32 2147483648, %v814_v25  ;;  %v855_v23 = vand.u32 2147483647, %v814_v25  ;;  %vm851_vm12 = vweird.f32 %v814_v25 }
 0x51e   :  { %v833_v20 = vsub.f32 1.0, %v832_v12  ;;  %v829_v49 = vsel %vm826_vm14, %v828_v31, %v824_v43 }
 0x51f   :  { %v858_v37 = vor.u32 1.1754944e-38, %v857_v38  ;;  %vm856_vm15 = vcmp.eq.f32.partialorder %v855_v23, 8.507059e+37 }
 0x520   :  { %v834_v21 = vmul.f32 %v1861_v15, %v833_v20 }
 0x522   :  { %v1863_v5 = vpop.eup %1862  ;;  %v835_v34 = vadd.f32 %v1861_v15, %v834_v21 }
 0x523   :  { %v1865_v22 = vpop.eup %1864  ;;  %v815_v9 = vadd.f32 1.0, %v1863_v5  ;;  %v934_v5 = vpop.f32.mrf.mxu0 }
 0x524   :  { %v847_v19 = vmul.f32 %v1865_v22, %v814_v25  ;;  %v839_v51 = vsel %vm838_vm8, %v1861_v15, %v835_v34  ;;  %vm852_vm9 = vweird.f32 %v1865_v22 }
 0x525   :  { %1866 = vrcp.f32 %v815_v9  ;;  %v844_v30 = vsel %vm841_vm11, %v843_v41, %v839_v51  ;;  %vm853_vm13 = vmor %vm851_vm12, %vm852_vm9  ;;  %v872_v33 = vand.u32 2147483648, %v815_v9  ;;  %vm866_vm2 = vweird.f32 %v815_v9 }
 0x526   :  { %v848_v28 = vsub.f32 1.0, %v847_v19  ;;  %v877_v62 = vmul.f32 %v844_v30, %v829_v49  ;;  %v870_v4 = vand.u32 2147483647, %v815_v9 }
 0x527   :  { %v873_v25 = vor.u32 1.1754944e-38, %v872_v33 }
 0x528   :  { %v849_v57 = vmul.f32 %v1865_v22, %v848_v28  ;;  %vm871_vm4 = vcmp.eq.f32.partialorder %v870_v4, 8.507059e+37  ;;  %v2841_v28 = vld [vmem:[%s3245_s0 + $0x28] sm:$0xff] }
 0x52a   :  { %v850_v44 = vadd.f32 %v1865_v22, %v849_v57 }
 0x52b   :  { %v1867_v45 = vpop.eup %1866 }
 0x52c   :  { %v854_v40 = vsel %vm853_vm13, %v1865_v22, %v850_v44  ;;  %v862_v47 = vmul.f32 %v1867_v45, %v815_v9  ;;  %vm867_vm1 = vweird.f32 %v1867_v45 }
 0x52d   :  { %v859_v54 = vsel %vm856_vm15, %v858_v37, %v854_v40  ;;  %vm868_vm3 = vmor %vm866_vm2, %vm867_vm1 }
 0x52e   :  { %v863_v59 = vsub.f32 1.0, %v862_v47  ;;  %v876_v61 = vmul.f32 %v859_v54, %v2702_v17 }
 0x530   :  { %v864_v18 = vmul.f32 %v1867_v45, %v863_v59  ;;  %v2783_v3 = vadd.f32 %v877_v62, %v876_v61  ;;  %v3001_v62 = vld [vmem:[%s3244_s3 + $0x28] sm:$0xff] }
 0x532   :  { %v865_v26 = vadd.f32 %v1867_v45, %v864_v18  ;;  %1868 = vtanh.f32 %v2783_v3 }
 0x534   :  { %v869_v15 = vsel %vm868_vm3, %v1867_v45, %v865_v26 }
 0x535   :  { %v874_v11 = vsel %vm871_vm4, %v873_v25, %v869_v15 }
 0x538   :  { %v1869_v12 = vpop.eup %1868 }
 0x539   :  { %v880_v20 = vmul.f32 %v1869_v12, %v874_v11 }
 0x53b   :  { %1748 = vst [vmem:[%s3248_s5 + $0x18] sm:$0xff] %v880_v20  ;;  %953 = vmatmul.f32.vlgmr.msrb.gmra.mxu1 %v880_v20  ;;  %973 = vmatmul.f32.vlgmr.msra.gmra.mxu2 %v880_v20 }
 0x5b8   :  { %v954_v21 = vpop.f32.mrf.mxu1 }
 0x5be   :  { %v974_v17 = vpop.f32.mrf.mxu2 }
 0x5bf   :  { %988 = vmatpush.msra.mxu3 %v974_v17 }
 0x5c1   :  { %989 = vmatpush.msra.mxu3 %v880_v20 }
 0x5c3   :  { %990 = vmatpush.msra.mxu3 %v954_v21 }
 0x5c5   :  { %991 = vmatpush.msra.mxu3 %v2772_v8  ;;  %v2804_v8 = vld [vmem:[%s3247_s1 + $0x8] sm:$0xff] }
 0x5c7   :  { %992 = vmatpush.msra.mxu3 %v934_v5 }
 0x5c8   :  { %1750 = vmatmul.msk.f32.vlgmr.msra.gmra.mxu3 %vm141_vm0, %v2793_v10 }
 0x5c9   :  { %1123 = vmatpush.msrb.mxu3 %v2403_v29  ;;  %v2815_v29 = vld [vmem:[%s3247_s1 + $0x10] sm:$0xff] }
 0x5cb   :  { %1124 = vmatpush.msrb.mxu3 %v2415_v14  ;;  %v2826_v14 = vld [vmem:[%s3247_s1 + $0x18] sm:$0xff] }
 0x5cd   :  { %1125 = vmatpush.msrb.mxu3 %v2430_v36 }
 0x5cf   :  { %1126 = vmatpush.msrb.mxu3 %v2444_v39 }
 0x5d0   :  { %1751 = vmatmul.msk.f32.gmra.mxu3 %vm141_vm0, %v2804_v8 }
 0x5d1   :  { %1127 = vmatpush.msrb.mxu3 %v2458_v42 }
 0x5d3   :  { %1128 = vmatpush.msrb.mxu3 %v2472_v48 }
 0x5d5   :  { %1129 = vmatpush.msrb.mxu3 %v2487_v53 }
 0x5d7   :  { %1130 = vmatpush.msrb.mxu3 %v2501_v58 }
 0x5d8   :  { %1752 = vmatmul.msk.f32.gmra.mxu3 %vm141_vm0, %v2815_v29 }
 0x5d9   :  { %1131 = vmatpush.msrb.mxu3 %v2515_v60 }
 0x5db   :  { %1132 = vmatpush.msrb.mxu3 %v2531_v1 }
 0x5dd   :  { %1133 = vmatpush.msrb.mxu3 %v2541_v6 }
 0x5df   :  { %1134 = vmatpush.msrb.mxu3 %v2556_v16 }
 0x5e0   :  { %1753 = vmatmul.msk.f32.gmra.mxu3 %vm141_vm0, %v2826_v14 }
 0x5e1   :  { %1135 = vmatpush.msrb.mxu3 %v2571_v24 }
 0x5e3   :  { %1136 = vmatpush.msrb.mxu3 %v2587_v32 }
 0x5e5   :  { %1137 = vmatpush.msrb.mxu3 %v2602_v2 }
 0x5e7   :  { %1138 = vmatpush.msrb.mxu3 %v2619_v13 }
 0x5e8   :  { %1139 = vmatmul.f32.vlgmr.msrb.gmra.mxu3 %v2841_v28 }
 0x64b   :  { %v994_v36 = vpop.f32.mrf.mxu3 }
 0x64c   :  { %v995_v39 = vadd.f32 %v994_v36, %v2311_v46 }
 0x64e   :  { %v1754_v42 = vmul.f32 -1.442695, %v995_v39 }
 0x650   :  { %1870 = vpow2.f32 %v1754_v42 }
 0x653   :  { %v997_v48 = vpop.f32.mrf.mxu3 }
 0x654   :  { %v998_v53 = vadd.f32 %v997_v48, %v2314_v50 }
 0x656   :  { %v1871_v58 = vpop.eup %1870  ;;  %v1755_v60 = vmul.f32 -1.442695, %v998_v53 }
 0x657   :  { %v1018_v1 = vadd.f32 1.0, %v1871_v58 }
 0x658   :  { %1872 = vpow2.f32 %v1755_v60 }
 0x659   :  { %1874 = vrcp.f32 %v1018_v1  ;;  %vm1027_vm8 = vweird.f32 %v1018_v1  ;;  %v1031_v40 = vand.u32 2147483647, %v1018_v1  ;;  %v1033_v47 = vand.u32 2147483648, %v1018_v1 }
 0x65b   :  { %v1000_v6 = vpop.f32.mrf.mxu3  ;;  %v1034_v15 = vor.u32 1.1754944e-38, %v1033_v47  ;;  %vm1032_vm15 = vcmp.eq.f32.partialorder %v1031_v40, 8.507059e+37  ;;  %v2967_v40 = vld [vmem:[%s3243_s4 + $0x40] sm:$0xff]  ;;  %v2975_v47 = vld [vmem:[%s3244_s3 + $0x38] sm:$0xff] }
 0x65c   :  { %v1001_v16 = vadd.f32 %v1000_v6, %v2317_v56 }
 0x65e   :  { %v1873_v24 = vpop.eup %1872  ;;  %v1756_v32 = vmul.f32 -1.442695, %v1001_v16 }
 0x65f   :  { %v1019_v2 = vadd.f32 1.0, %v1873_v24  ;;  %v1875_v13 = vpop.eup %1874 }
 0x660   :  { %1876 = vpow2.f32 %v1756_v32  ;;  %v1023_v19 = vmul.f32 %v1875_v13, %v1018_v1  ;;  %vm1028_vm6 = vweird.f32 %v1875_v13 }
 0x661   :  { %1878 = vrcp.f32 %v1019_v2  ;;  %v1048_v45 = vand.u32 2147483648, %v1019_v2  ;;  %vm1042_vm7 = vweird.f32 %v1019_v2  ;;  %v1046_v30 = vand.u32 2147483647, %v1019_v2  ;;  %vm2845_vm11 = vmor %vm1027_vm8, %vm1028_vm6 }
 0x662   :  { %v1024_v0 = vsub.f32 1.0, %v1023_v19  ;;  %v2887_v19 = vld [vmem:[%s3243_s4 + $0x70] sm:$0xff] }
 0x663   :  { %v1003_v22 = vpop.f32.mrf.mxu3  ;;  %v1049_v18 = vor.u32 1.1754944e-38, %v1048_v45  ;;  %vm1047_vm12 = vcmp.eq.f32.partialorder %v1046_v30, 8.507059e+37  ;;  %v2954_v45 = vld [vmem:[%s3243_s4 + $0x48] sm:$0xff] }
 0x664   :  { %v1004_v9 = vadd.f32 %v1003_v22, %v2320_v63  ;;  %v1025_v23 = vmul.f32 %v1875_v13, %v1024_v0  ;;  %v2870_v22 = vld [vmem:[%s3244_s3 + $0x78] sm:$0xff]  ;;  %v2909_v0 = vld [vmem:[%s3244_s3 + $0x60] sm:$0xff] }
 0x665   :  { %1349 = vmatpush.msra.mxu3 %v2870_v22 }
 0x666   :  { %v1877_v34 = vpop.eup %1876  ;;  %v1757_v55 = vmul.f32 -1.442695, %v1004_v9  ;;  %v1026_v31 = vadd.f32 %v1875_v13, %v1025_v23  ;;  %v2875_v9 = vld [vmem:[%s3243_s4 + $0x78] sm:$0xff]  ;;  %v2935_v23 = vld [vmem:[%s3244_s3 + $0x50] sm:$0xff] }
 0x667   :  { %v1879_v27 = vpop.eup %1878  ;;  %v1020_v7 = vadd.f32 1.0, %v1877_v34  ;;  %1369 = vmatpush.msrb.mxu0 %v2875_v9  ;;  %v2882_v34 = vld [vmem:[%s3244_s3 + $0x70] sm:$0xff] }
 0x668   :  { %v1038_v35 = vmul.f32 %v1879_v27, %v1019_v2  ;;  %1880 = vpow2.f32 %v1757_v55  ;;  %vm1043_vm5 = vweird.f32 %v1879_v27  ;;  %v1030_v26 = vsel %vm2845_vm11, %v1875_v13, %v1026_v31  ;;  %1350 = vmatpush.msra.mxu3 %v2882_v34 }
 0x669   :  { %1882 = vrcp.f32 %v1020_v7  ;;  %vm1044_vm9 = vmor %vm1042_vm7, %vm1043_vm5  ;;  %v1063_v49 = vand.u32 2147483648, %v1020_v7  ;;  %v1061_v61 = vand.u32 2147483647, %v1020_v7  ;;  %vm1057_vm13 = vweird.f32 %v1020_v7  ;;  %1370 = vmatpush.msrb.mxu0 %v2887_v19 }
 0x66a   :  { %v1039_v38 = vsub.f32 1.0, %v1038_v35  ;;  %v1035_v17 = vsel %vm1032_vm15, %v1034_v15, %v1030_v26  ;;  %v3008_v26 = vld [vmem:[%s3243_s4 + $0x28] sm:$0xff]  ;;  %v3020_v15 = vld [vmem:[%s3243_s4 + $0x20] sm:$0xff] }
 0x66b   :  { %v1064_v12 = vor.u32 1.1754944e-38, %v1063_v49  ;;  %vm1062_vm1 = vcmp.eq.f32.partialorder %v1061_v61, 8.507059e+37  ;;  %v1140_v13 = vpop.f32.mrf.mxu3  ;;  %v2980_v49 = vld [vmem:[%s3243_s4 + $0x38] sm:$0xff]  ;;  %v2995_v61 = vld [vmem:[%s3243_s4 + $0x30] sm:$0xff] }
 0x66c   :  { %v1040_v51 = vmul.f32 %v1879_v27, %v1039_v38  ;;  %v2914_v38 = vld [vmem:[%s3243_s4 + $0x60] sm:$0xff] }
 0x66e   :  { %v1881_v57 = vpop.eup %1880  ;;  %v1041_v43 = vadd.f32 %v1879_v27, %v1040_v51  ;;  %v2922_v51 = vld [vmem:[%s3244_s3 + $0x58] sm:$0xff] }
 0x66f   :  { %v1883_v52 = vpop.eup %1882  ;;  %v1021_v41 = vadd.f32 1.0, %v1881_v57  ;;  %v2927_v57 = vld [vmem:[%s3243_s4 + $0x58] sm:$0xff] }
 0x670   :  { %v1053_v44 = vmul.f32 %v1883_v52, %v1020_v7  ;;  %v1045_v54 = vsel %vm1044_vm9, %v1879_v27, %v1041_v43  ;;  %vm1058_vm10 = vweird.f32 %v1883_v52  ;;  %v2896_v7 = vld [vmem:[%s3244_s3 + $0x68] sm:$0xff] }
 0x671   :  { %1884 = vrcp.f32 %v1021_v41  ;;  %v1050_v25 = vsel %vm1047_vm12, %v1049_v18, %v1045_v54  ;;  %vm1059_vm14 = vmor %vm1057_vm13, %vm1058_vm10  ;;  %v1078_v58 = vand.u32 2147483648, %v1021_v41  ;;  %vm1072_vm3 = vweird.f32 %v1021_v41  ;;  %1351 = vmatpush.msra.mxu3 %v2896_v7 }
 0x672   :  { %v1054_v37 = vsub.f32 1.0, %v1053_v44  ;;  %v1083_v39 = vmul.f32 %v1050_v25, %v1035_v17  ;;  %v1076_v60 = vand.u32 2147483647, %v1021_v41  ;;  %v2949_v44 = vld [vmem:[%s3244_s3 + $0x48] sm:$0xff] }
 0x673   :  { %v1079_v6 = vor.u32 1.1754944e-38, %v1078_v58  ;;  %1352 = vmatpush.msra.mxu3 %v2909_v0 }
 0x674   :  { %v1055_v59 = vmul.f32 %v1883_v52, %v1054_v37  ;;  %vm1077_vm5 = vcmp.eq.f32.partialorder %v1076_v60, 8.507059e+37  ;;  %v2962_v37 = vld [vmem:[%s3244_s3 + $0x40] sm:$0xff] }
 0x675   :  { %1353 = vmatpush.msra.mxu3 %v2922_v51  ;;  %v3074_v60 = vld [vmem:[%s3244_s3] sm:$0xff] }
 0x676   :  { %v1056_v33 = vadd.f32 %v1883_v52, %v1055_v59  ;;  %v2990_v59 = vld [vmem:[%s3244_s3 + $0x30] sm:$0xff] }
 0x677   :  { %v1885_v4 = vpop.eup %1884  ;;  %1354 = vmatpush.msra.mxu3 %v2935_v23 }
 0x678   :  { %v1060_v11 = vsel %vm1059_vm14, %v1883_v52, %v1056_v33  ;;  %v1068_v20 = vmul.f32 %v1885_v4, %v1021_v41  ;;  %vm1073_vm2 = vweird.f32 %v1885_v4  ;;  %v2940_v52 = vld [vmem:[%s3243_s4 + $0x50] sm:$0xff] }
 0x679   :  { %v1065_v21 = vsel %vm1062_vm1, %v1064_v12, %v1060_v11  ;;  %vm1074_vm4 = vmor %vm1072_vm3, %vm1073_vm2  ;;  %1355 = vmatpush.msra.mxu3 %v2949_v44  ;;  %v3029_v11 = vld [vmem:[%s3244_s3 + $0x18] sm:$0xff] }
 0x67a   :  { %v1069_v5 = vsub.f32 1.0, %v1068_v20  ;;  %v1082_v36 = vmul.f32 %v1065_v21, %v2783_v3  ;;  %v3034_v20 = vld [vmem:[%s3243_s4 + $0x18] sm:$0xff]  ;;  %v3044_v21 = vld [vmem:[%s3244_s3 + $0x10] sm:$0xff] }
 0x67b   :  { %1356 = vmatpush.msra.mxu3 %v2962_v37 }
 0x67c   :  { %v1070_v42 = vmul.f32 %v1885_v4, %v1069_v5  ;;  %v2852_v48 = vadd.f32 %v1083_v39, %v1082_v36  ;;  %v3049_v5 = vld [vmem:[%s3243_s4 + $0x10] sm:$0xff]  ;;  %v3058_v36 = vld [vmem:[%s3244_s3 + $0x8] sm:$0xff] }
 0x67d   :  { %1357 = vmatpush.msra.mxu3 %v2975_v47  ;;  %v3063_v39 = vld [vmem:[%s3243_s4 + $0x8] sm:$0xff] }
 0x67e   :  { %v1071_v53 = vadd.f32 %v1885_v4, %v1070_v42  ;;  %1886 = vtanh.f32 %v2852_v48 }
 0x67f   :  { %1358 = vmatpush.msra.mxu3 %v2990_v59 }
 0x680   :  { %v1075_v1 = vsel %vm1074_vm4, %v1885_v4, %v1071_v53  ;;  %v3015_v4 = vld [vmem:[%s3244_s3 + $0x20] sm:$0xff] }
 0x681   :  { %v1080_v24 = vsel %vm1077_vm5, %v1079_v6, %v1075_v1  ;;  %1359 = vmatpush.msra.mxu3 %v3001_v62  ;;  %v3079_v1 = vld [vmem:[%s3243_s4] sm:$0xff] }
 0x683   :  { %1360 = vmatpush.msra.mxu3 %v3015_v4 }
 0x684   :  { %v1887_v16 = vpop.eup %1886 }
 0x685   :  { %v1086_v32 = vmul.f32 %v1887_v16, %v1080_v24  ;;  %1361 = vmatpush.msra.mxu3 %v3029_v11 }
 0x687   :  { %1758 = vst [vmem:[%s3248_s5 + $0x20] sm:$0xff] %v1086_v32  ;;  %1159 = vmatmul.f32.vlgmr.msra.gmra.mxu0 %v1086_v32  ;;  %1179 = vmatmul.f32.vlgmr.msra.gmra.mxu1 %v1086_v32 }
 0x688   :  { %1362 = vmatpush.msra.mxu3 %v3044_v21 }
 0x68a   :  { %1363 = vmatpush.msra.mxu3 %v3058_v36 }
 0x68c   :  { %1364 = vmatpush.msra.mxu3 %v3074_v60 }
 0x68e   :  { %1575 = vmatpush.msrb.mxu3 %v2875_v9 }
 0x690   :  { %1576 = vmatpush.msrb.mxu3 %v2887_v19 }
 0x704   :  { %v1180_v3 = vpop.f32.mrf.mxu1  ;;  %v1160_v2 = vpop.f32.mrf.mxu0 }
 0x705   :  { %1194 = vmatpush.msrb.mxu2 %v1180_v3 }
 0x707   :  { %1195 = vmatpush.msrb.mxu2 %v1086_v32 }
 0x709   :  { %1196 = vmatpush.msrb.mxu2 %v1160_v2  ;;  %v3093_v2 = vld [vmem:[%s3245_s0 + $0x30] sm:$0xff] }
 0x70b   :  { %1197 = vmatpush.msrb.mxu2 %v2841_v28  ;;  %v2901_v28 = vld [vmem:[%s3243_s4 + $0x68] sm:$0xff] }
 0x70c   :  { %1371 = vmatpush.msrb.mxu0 %v2901_v28  ;;  %1577 = vmatpush.msrb.mxu3 %v2901_v28 }
 0x70d   :  { %1198 = vmatpush.msrb.mxu2 %v1140_v13 }
 0x70e   :  { %1760 = vmatmul.msk.f32.vlgmr.msrb.gmra.mxu2 %vm141_vm0, %v2793_v10  ;;  %1372 = vmatpush.msrb.mxu0 %v2914_v38 }
 0x70f   :  { %1329 = vmatpush.msra.mxu2 %v2870_v22  ;;  %1578 = vmatpush.msrb.mxu3 %v2914_v38 }
 0x710   :  { %1373 = vmatpush.msrb.mxu0 %v2927_v57 }
 0x711   :  { %1330 = vmatpush.msra.mxu2 %v2882_v34  ;;  %1579 = vmatpush.msrb.mxu3 %v2927_v57 }
 0x712   :  { %1374 = vmatpush.msrb.mxu0 %v2940_v52 }
 0x713   :  { %1331 = vmatpush.msra.mxu2 %v2896_v7  ;;  %1580 = vmatpush.msrb.mxu3 %v2940_v52 }
 0x714   :  { %1375 = vmatpush.msrb.mxu0 %v2954_v45 }
 0x715   :  { %1332 = vmatpush.msra.mxu2 %v2909_v0  ;;  %1581 = vmatpush.msrb.mxu3 %v2954_v45 }
 0x716   :  { %1761 = vmatmul.msk.f32.gmra.mxu2 %vm141_vm0, %v2804_v8  ;;  %1376 = vmatpush.msrb.mxu0 %v2967_v40 }
 0x717   :  { %1333 = vmatpush.msra.mxu2 %v2922_v51  ;;  %1582 = vmatpush.msrb.mxu3 %v2967_v40 }
 0x718   :  { %1377 = vmatpush.msrb.mxu0 %v2980_v49 }
 0x719   :  { %1334 = vmatpush.msra.mxu2 %v2935_v23  ;;  %1583 = vmatpush.msrb.mxu3 %v2980_v49 }
 0x71a   :  { %1378 = vmatpush.msrb.mxu0 %v2995_v61 }
 0x71b   :  { %1335 = vmatpush.msra.mxu2 %v2949_v44  ;;  %1584 = vmatpush.msrb.mxu3 %v2995_v61 }
 0x71c   :  { %1379 = vmatpush.msrb.mxu0 %v3008_v26 }
 0x71d   :  { %1336 = vmatpush.msra.mxu2 %v2962_v37  ;;  %1585 = vmatpush.msrb.mxu3 %v3008_v26 }
 0x71e   :  { %1762 = vmatmul.msk.f32.gmra.mxu2 %vm141_vm0, %v2815_v29  ;;  %1380 = vmatpush.msrb.mxu0 %v3020_v15 }
 0x71f   :  { %1337 = vmatpush.msra.mxu2 %v2975_v47  ;;  %1586 = vmatpush.msrb.mxu3 %v3020_v15 }
 0x720   :  { %1381 = vmatpush.msrb.mxu0 %v3034_v20 }
 0x721   :  { %1338 = vmatpush.msra.mxu2 %v2990_v59  ;;  %1587 = vmatpush.msrb.mxu3 %v3034_v20 }
 0x722   :  { %1382 = vmatpush.msrb.mxu0 %v3049_v5 }
 0x723   :  { %1339 = vmatpush.msra.mxu2 %v3001_v62  ;;  %1588 = vmatpush.msrb.mxu3 %v3049_v5 }
 0x724   :  { %1383 = vmatpush.msrb.mxu0 %v3063_v39 }
 0x725   :  { %1340 = vmatpush.msra.mxu2 %v3015_v4  ;;  %1589 = vmatpush.msrb.mxu3 %v3063_v39 }
 0x726   :  { %1763 = vmatmul.msk.f32.gmra.mxu2 %vm141_vm0, %v2826_v14  ;;  %1384 = vmatpush.msrb.mxu0 %v3079_v1 }
 0x727   :  { %1341 = vmatpush.msra.mxu2 %v3029_v11  ;;  %1590 = vmatpush.msrb.mxu3 %v3079_v1 }
 0x729   :  { %1342 = vmatpush.msra.mxu2 %v3044_v21 }
 0x72b   :  { %1343 = vmatpush.msra.mxu2 %v3058_v36 }
 0x72d   :  { %1344 = vmatpush.msra.mxu2 %v3074_v60 }
 0x72e   :  { %1345 = vmatmul.f32.vlgmr.msra.gmra.mxu2 %v3093_v2 }
 0x72f   :  { %1555 = vmatpush.msrb.mxu2 %v2870_v22 }
 0x731   :  { %1556 = vmatpush.msrb.mxu2 %v2882_v34 }
 0x733   :  { %1557 = vmatpush.msrb.mxu2 %v2896_v7 }
 0x735   :  { %1558 = vmatpush.msrb.mxu2 %v2909_v0 }
 0x737   :  { %1559 = vmatpush.msrb.mxu2 %v2922_v51 }
 0x739   :  { %1560 = vmatpush.msrb.mxu2 %v2935_v23 }
 0x73b   :  { %1561 = vmatpush.msrb.mxu2 %v2949_v44 }
 0x73d   :  { %1562 = vmatpush.msrb.mxu2 %v2962_v37 }
 0x73f   :  { %1563 = vmatpush.msrb.mxu2 %v2975_v47 }
 0x741   :  { %1564 = vmatpush.msrb.mxu2 %v2990_v59 }
 0x743   :  { %1565 = vmatpush.msrb.mxu2 %v3001_v62 }
 0x745   :  { %1566 = vmatpush.msrb.mxu2 %v3015_v4 }
 0x747   :  { %1567 = vmatpush.msrb.mxu2 %v3029_v11 }
 0x749   :  { %1568 = vmatpush.msrb.mxu2 %v3044_v21 }
 0x74b   :  { %1569 = vmatpush.msrb.mxu2 %v3058_v36 }
 0x74d   :  { %1570 = vmatpush.msrb.mxu2 %v3074_v60 }
 0x791   :  { %v1200_v55 = vpop.f32.mrf.mxu2 }
 0x792   :  { %v1201_v27 = vadd.f32 %v1200_v55, %v2311_v46 }
 0x794   :  { %v1764_v35 = vmul.f32 -1.442695, %v1201_v27 }
 0x796   :  { %1888 = vpow2.f32 %v1764_v35 }
 0x799   :  { %v1203_v41 = vpop.f32.mrf.mxu2 }
 0x79a   :  { %v1204_v43 = vadd.f32 %v1203_v41, %v2314_v50 }
 0x79c   :  { %v1889_v31 = vpop.eup %1888  ;;  %v1765_v30 = vmul.f32 -1.442695, %v1204_v43 }
 0x79d   :  { %v2983_v54 = vadd.f32 1.0, %v1889_v31 }
 0x79e   :  { %1890 = vpow2.f32 %v1765_v30 }
 0x79f   :  { %1892 = vrcp.f32 %v2983_v54  ;;  %vm1233_vm9 = vweird.f32 %v2983_v54  ;;  %v1237_v57 = vand.u32 2147483647, %v2983_v54 }
 0x7a1   :  { %v1206_v18 = vpop.f32.mrf.mxu2  ;;  %vm1238_vm1 = vcmp.eq.f32.partialorder %v1237_v57, 8.507059e+37  ;;  %v3207_v57 = vld [vmem:[%s3245_s0 + $0x38] sm:$0xff] }
 0x7a2   :  { %v1207_v33 = vadd.f32 %v1206_v18, %v2317_v56 }
 0x7a4   :  { %v1891_v25 = vpop.eup %1890  ;;  %v1766_v12 = vmul.f32 -1.442695, %v1207_v33 }
 0x7a5   :  { %v3036_v17 = vadd.f32 1.0, %v1891_v25  ;;  %v3065_v42 = vpop.eup %1892  ;;  %v1239_v25 = vand.u32 2147483648, %v2983_v54 }
 0x7a6   :  { %1894 = vpow2.f32 %v1766_v12  ;;  %v1229_v16 = vmul.f32 %v3065_v42, %v2983_v54  ;;  %vm1234_vm7 = vweird.f32 %v3065_v42 }
 0x7a7   :  { %1896 = vrcp.f32 %v3036_v17  ;;  %v1254_v19 = vand.u32 2147483648, %v3036_v17  ;;  %vm1248_vm8 = vweird.f32 %v3036_v17  ;;  %v1252_v38 = vand.u32 2147483647, %v3036_v17  ;;  %vm3136_vm12 = vmor %vm1233_vm9, %vm1234_vm7 }
 0x7a8   :  { %v1230_v55 = vsub.f32 1.0, %v1229_v16 }
 0x7a9   :  { %v1209_v53 = vpop.f32.mrf.mxu2  ;;  %vm1253_vm13 = vcmp.eq.f32.partialorder %v1252_v38, 8.507059e+37 }
 0x7aa   :  { %v1210_v58 = vadd.f32 %v1209_v53, %v2320_v63  ;;  %v1231_v43 = vmul.f32 %v3065_v42, %v1230_v55 }
 0x7ac   :  { %v1895_v6 = vpop.eup %1894  ;;  %v1767_v24 = vmul.f32 -1.442695, %v1210_v58  ;;  %v1232_v28 = vadd.f32 %v3065_v42, %v1231_v43 }
 0x7ad   :  { %v1897_v32 = vpop.eup %1896  ;;  %v3086_v3 = vadd.f32 1.0, %v1895_v6  ;;  %v1255_v6 = vor.u32 1.1754944e-38, %v1254_v19 }
 0x7ae   :  { %v1244_v13 = vmul.f32 %v1897_v32, %v3036_v17  ;;  %1898 = vpow2.f32 %v1767_v24  ;;  %vm1249_vm6 = vweird.f32 %v1897_v32  ;;  %v1236_v16 = vsel %vm3136_vm12, %v3065_v42, %v1232_v28 }
 0x7af   :  { %1900 = vrcp.f32 %v3086_v3  ;;  %vm3124_vm10 = vmor %vm1248_vm8, %vm1249_vm6  ;;  %v1269_v53 = vand.u32 2147483648, %v3086_v3  ;;  %v1267_v52 = vand.u32 2147483647, %v3086_v3  ;;  %vm1263_vm14 = vweird.f32 %v3086_v3 }
 0x7b0   :  { %v1245_v27 = vsub.f32 1.0, %v1244_v13 }
 0x7b1   :  { %v1270_v55 = vor.u32 1.1754944e-38, %v1269_v53  ;;  %vm1268_vm2 = vcmp.eq.f32.partialorder %v1267_v52, 8.507059e+37 }
 0x7b2   :  { %v1246_v35 = vmul.f32 %v1897_v32, %v1245_v27 }
 0x7b4   :  { %v1899_v41 = vpop.eup %1898  ;;  %v1247_v30 = vadd.f32 %v1897_v32, %v1246_v35 }
 0x7b5   :  { %v1901_v9 = vpop.eup %1900  ;;  %v3107_v31 = vadd.f32 1.0, %v1899_v41 }
 0x7b6   :  { %v1259_v18 = vmul.f32 %v1901_v9, %v3086_v3  ;;  %v1251_v17 = vsel %vm3124_vm10, %v1897_v32, %v1247_v30  ;;  %vm1264_vm11 = vweird.f32 %v1901_v9  ;;  %v1240_v32 = vor.u32 1.1754944e-38, %v1239_v25 }
 0x7b7   :  { %1902 = vrcp.f32 %v3107_v31  ;;  %v1256_v13 = vsel %vm1253_vm13, %v1255_v6, %v1251_v17  ;;  %vm1265_vm15 = vmor %vm1263_vm14, %vm1264_vm11  ;;  %v1284_v49 = vand.u32 2147483648, %v3107_v31  ;;  %vm1278_vm4 = vweird.f32 %v3107_v31 }
 0x7b8   :  { %v1260_v33 = vsub.f32 1.0, %v1259_v18  ;;  %v1241_v42 = vsel %vm1238_vm1, %v1240_v32, %v1236_v16 }
 0x7b9   :  { %v1289_v43 = vmul.f32 %v1256_v13, %v1241_v42  ;;  %v1285_v26 = vor.u32 1.1754944e-38, %v1284_v49 }
 0x7ba   :  { %v1261_v58 = vmul.f32 %v1901_v9, %v1260_v33 }
 0x7bc   :  { %v1262_v24 = vadd.f32 %v1901_v9, %v1261_v58 }
 0x7bd   :  { %v1903_v45 = vpop.eup %1902 }
 0x7be   :  { %v1266_v27 = vsel %vm1265_vm15, %v1901_v9, %v1262_v24  ;;  %v1274_v35 = vmul.f32 %v1903_v45, %v3107_v31  ;;  %vm1279_vm3 = vweird.f32 %v1903_v45 }
 0x7bf   :  { %v1271_v3 = vsel %vm1268_vm2, %v1270_v55, %v1266_v27  ;;  %vm1280_vm5 = vmor %vm1278_vm4, %vm1279_vm3 }
 0x7c0   :  { %v1275_v41 = vsub.f32 1.0, %v1274_v35  ;;  %v1288_v40 = vmul.f32 %v1271_v3, %v2852_v48  ;;  %v1282_v48 = vand.u32 2147483647, %v3107_v31  ;;  %v1346_v31 = vpop.f32.mrf.mxu2 }
 0x7c2   :  { %v1276_v30 = vmul.f32 %v1903_v45, %v1275_v41  ;;  %v3153_v18 = vadd.f32 %v1289_v43, %v1288_v40  ;;  %vm1283_vm6 = vcmp.eq.f32.partialorder %v1282_v48, 8.507059e+37 }
 0x7c4   :  { %v1277_v9 = vadd.f32 %v1903_v45, %v1276_v30  ;;  %1904 = vtanh.f32 %v3153_v18 }
 0x7c6   :  { %v1281_v61 = vsel %vm1280_vm5, %v1903_v45, %v1277_v9 }
 0x7c7   :  { %v1286_v28 = vsel %vm1283_vm6, %v1285_v26, %v1281_v61 }
 0x7ca   :  { %v1905_v19 = vpop.eup %1904 }
 0x7cb   :  { %v1292_v15 = vmul.f32 %v1905_v19, %v1286_v28 }
 0x7cd   :  { %1768 = vst [vmem:[%s3248_s5 + $0x28] sm:$0xff] %v1292_v15  ;;  %1365 = vmatmul.f32.vlgmr.msra.gmra.mxu3 %v1292_v15  ;;  %1385 = vmatmul.f32.vlgmr.msrb.gmra.mxu0 %v1292_v15 }
 0x84a   :  { %v1386_v20 = vpop.f32.mrf.mxu0 }
 0x84b   :  { %1400 = vmatpush.msrb.mxu1 %v1386_v20 }
 0x84d   :  { %1401 = vmatpush.msrb.mxu1 %v1292_v15 }
 0x850   :  { %v1366_v5 = vpop.f32.mrf.mxu3 }
 0x851   :  { %1402 = vmatpush.msrb.mxu1 %v1366_v5 }
 0x853   :  { %1403 = vmatpush.msrb.mxu1 %v3093_v2 }
 0x855   :  { %1404 = vmatpush.msrb.mxu1 %v1346_v31 }
 0x856   :  { %1770 = vmatmul.msk.f32.vlgmr.msrb.gmra.mxu1 %vm141_vm0, %v2793_v10 }
 0x857   :  { %1535 = vmatpush.msra.mxu1 %v2870_v22 }
 0x859   :  { %1536 = vmatpush.msra.mxu1 %v2882_v34 }
 0x85b   :  { %1537 = vmatpush.msra.mxu1 %v2896_v7 }
 0x85d   :  { %1538 = vmatpush.msra.mxu1 %v2909_v0 }
 0x85e   :  { %1771 = vmatmul.msk.f32.gmra.mxu1 %vm141_vm0, %v2804_v8 }
 0x85f   :  { %1539 = vmatpush.msra.mxu1 %v2922_v51 }
 0x861   :  { %1540 = vmatpush.msra.mxu1 %v2935_v23 }
 0x863   :  { %1541 = vmatpush.msra.mxu1 %v2949_v44 }
 0x865   :  { %1542 = vmatpush.msra.mxu1 %v2962_v37 }
 0x866   :  { %1772 = vmatmul.msk.f32.gmra.mxu1 %vm141_vm0, %v2815_v29 }
 0x867   :  { %1543 = vmatpush.msra.mxu1 %v2975_v47 }
 0x869   :  { %1544 = vmatpush.msra.mxu1 %v2990_v59 }
 0x86b   :  { %1545 = vmatpush.msra.mxu1 %v3001_v62 }
 0x86d   :  { %1546 = vmatpush.msra.mxu1 %v3015_v4 }
 0x86e   :  { %1773 = vmatmul.msk.f32.gmra.mxu1 %vm141_vm0, %v2826_v14 }
 0x86f   :  { %1547 = vmatpush.msra.mxu1 %v3029_v11 }
 0x871   :  { %1548 = vmatpush.msra.mxu1 %v3044_v21 }
 0x873   :  { %1549 = vmatpush.msra.mxu1 %v3058_v36 }
 0x875   :  { %1550 = vmatpush.msra.mxu1 %v3074_v60 }
 0x876   :  { %1551 = vmatmul.f32.vlgmr.msra.gmra.mxu1 %v3207_v57 }
 0x8d3   :  { %v1406_v22 = vpop.f32.mrf.mxu1 }
 0x8d4   :  { %v1407_v34 = vadd.f32 %v1406_v22, %v2311_v46 }
 0x8d6   :  { %v1774_v7 = vmul.f32 -1.442695, %v1407_v34 }
 0x8d8   :  { %1906 = vpow2.f32 %v1774_v7 }
 0x8db   :  { %v1409_v0 = vpop.f32.mrf.mxu1 }
 0x8dc   :  { %v1410_v51 = vadd.f32 %v1409_v0, %v2314_v50 }
 0x8de   :  { %v1907_v23 = vpop.eup %1906  ;;  %v1775_v44 = vmul.f32 -1.442695, %v1410_v51 }
 0x8df   :  { %v1430_v37 = vadd.f32 1.0, %v1907_v23 }
 0x8e0   :  { %1908 = vpow2.f32 %v1775_v44 }
 0x8e1   :  { %1910 = vrcp.f32 %v1430_v37  ;;  %vm1439_vm10 = vweird.f32 %v1430_v37  ;;  %v1443_v27 = vand.u32 2147483647, %v1430_v37  ;;  %v1445_v35 = vand.u32 2147483648, %v1430_v37 }
 0x8e3   :  { %v1412_v47 = vpop.f32.mrf.mxu1  ;;  %v1446_v61 = vor.u32 1.1754944e-38, %v1445_v35  ;;  %vm1444_vm2 = vcmp.eq.f32.partialorder %v1443_v27, 8.507059e+37 }
 0x8e4   :  { %v1413_v59 = vadd.f32 %v1412_v47, %v2317_v56 }
 0x8e6   :  { %v1909_v62 = vpop.eup %1908  ;;  %v1776_v4 = vmul.f32 -1.442695, %v1413_v59 }
 0x8e7   :  { %v1431_v11 = vadd.f32 1.0, %v1909_v62  ;;  %v1911_v21 = vpop.eup %1910 }
 0x8e8   :  { %1912 = vpow2.f32 %v1776_v4  ;;  %v1435_v1 = vmul.f32 %v1911_v21, %v1430_v37  ;;  %vm1440_vm8 = vweird.f32 %v1911_v21 }
 0x8e9   :  { %1914 = vrcp.f32 %v1431_v11  ;;  %v1460_v45 = vand.u32 2147483648, %v1431_v11  ;;  %vm1454_vm9 = vweird.f32 %v1431_v11  ;;  %v1458_v13 = vand.u32 2147483647, %v1431_v11  ;;  %vm3211_vm13 = vmor %vm1439_vm10, %vm1440_vm8 }
 0x8ea   :  { %v1436_v12 = vsub.f32 1.0, %v1435_v1 }
 0x8eb   :  { %v1415_v36 = vpop.f32.mrf.mxu1  ;;  %v1461_v30 = vor.u32 1.1754944e-38, %v1460_v45  ;;  %vm1459_vm14 = vcmp.eq.f32.partialorder %v1458_v13, 8.507059e+37 }
 0x8ec   :  { %v1416_v39 = vadd.f32 %v1415_v36, %v2320_v63  ;;  %v1437_v52 = vmul.f32 %v1911_v21, %v1436_v12 }
 0x8ee   :  { %v1913_v60 = vpop.eup %1912  ;;  %v1777_v2 = vmul.f32 -1.442695, %v1416_v39  ;;  %v1438_v32 = vadd.f32 %v1911_v21, %v1437_v52 }
 0x8ef   :  { %v1915_v38 = vpop.eup %1914  ;;  %v1432_v33 = vadd.f32 1.0, %v1913_v60 }
 0x8f0   :  { %v1450_v25 = vmul.f32 %v1915_v38, %v1431_v11  ;;  %1916 = vpow2.f32 %v1777_v2  ;;  %vm1455_vm7 = vweird.f32 %v1915_v38  ;;  %v1442_v9 = vsel %vm3211_vm13, %v1911_v21, %v1438_v32 }
 0x8f1   :  { %1918 = vrcp.f32 %v1432_v33  ;;  %vm1456_vm11 = vmor %vm1454_vm9, %vm1455_vm7  ;;  %v1475_v42 = vand.u32 2147483648, %v1432_v33  ;;  %v1473_v40 = vand.u32 2147483647, %v1432_v33  ;;  %vm1469_vm15 = vweird.f32 %v1432_v33 }
 0x8f2   :  { %v1451_v53 = vsub.f32 1.0, %v1450_v25  ;;  %v1447_v20 = vsel %vm1444_vm2, %v1446_v61, %v1442_v9 }
 0x8f3   :  { %v1476_v19 = vor.u32 1.1754944e-38, %v1475_v42  ;;  %vm1474_vm3 = vcmp.eq.f32.partialorder %v1473_v40, 8.507059e+37  ;;  %v1552_v21 = vpop.f32.mrf.mxu1 }
 0x8f4   :  { %v1452_v17 = vmul.f32 %v1915_v38, %v1451_v53 }
 0x8f6   :  { %v1917_v58 = vpop.eup %1916  ;;  %v1453_v16 = vadd.f32 %v1915_v38, %v1452_v17 }
 0x8f7   :  { %v1919_v54 = vpop.eup %1918  ;;  %v1433_v6 = vadd.f32 1.0, %v1917_v58 }
 0x8f8   :  { %v1465_v24 = vmul.f32 %v1919_v54, %v1432_v33  ;;  %v1457_v3 = vsel %vm1456_vm11, %v1915_v38, %v1453_v16  ;;  %vm1470_vm12 = vweird.f32 %v1919_v54 }
 0x8f9   :  { %1920 = vrcp.f32 %v1433_v6  ;;  %v1462_v26 = vsel %vm1459_vm14, %v1461_v30, %v1457_v3  ;;  %vm1471_vm1 = vmor %vm1469_vm15, %vm1470_vm12  ;;  %v1490_v51 = vand.u32 2147483648, %v1433_v6  ;;  %vm1484_vm5 = vweird.f32 %v1433_v6 }
 0x8fa   :  { %v1466_v55 = vsub.f32 1.0, %v1465_v24  ;;  %v1495_v31 = vmul.f32 %v1462_v26, %v1447_v20  ;;  %v1488_v44 = vand.u32 2147483647, %v1433_v6 }
 0x8fb   :  { %v1491_v47 = vor.u32 1.1754944e-38, %v1490_v51 }
 0x8fc   :  { %v1467_v41 = vmul.f32 %v1919_v54, %v1466_v55  ;;  %vm1489_vm7 = vcmp.eq.f32.partialorder %v1488_v44, 8.507059e+37 }
 0x8fe   :  { %v1468_v49 = vadd.f32 %v1919_v54, %v1467_v41 }
 0x8ff   :  { %v1921_v48 = vpop.eup %1920 }
 0x900   :  { %v1472_v28 = vsel %vm1471_vm1, %v1919_v54, %v1468_v49  ;;  %v1480_v15 = vmul.f32 %v1921_v48, %v1433_v6  ;;  %vm1485_vm4 = vweird.f32 %v1921_v48 }
 0x901   :  { %v1477_v5 = vsel %vm1474_vm3, %v1476_v19, %v1472_v28  ;;  %vm1486_vm6 = vmor %vm1484_vm5, %vm1485_vm4 }
 0x902   :  { %v1494_v22 = vmul.f32 %v1477_v5, %v3153_v18  ;;  %v1481_v34 = vsub.f32 1.0, %v1480_v15 }
 0x904   :  { %v1482_v7 = vmul.f32 %v1921_v48, %v1481_v34  ;;  %v3218_v0 = vadd.f32 %v1495_v31, %v1494_v22 }
 0x906   :  { %v1483_v23 = vadd.f32 %v1921_v48, %v1482_v7  ;;  %1922 = vtanh.f32 %v3218_v0 }
 0x908   :  { %v1487_v37 = vsel %vm1486_vm6, %v1921_v48, %v1483_v23 }
 0x909   :  { %v1492_v62 = vsel %vm1489_vm7, %v1491_v47, %v1487_v37 }
 0x90c   :  { %v1923_v59 = vpop.eup %1922 }
 0x90d   :  { %v1498_v4 = vmul.f32 %v1923_v59, %v1492_v62 }
 0x90f   :  { %1778 = vst [vmem:[%s3248_s5 + $0x30] sm:$0xff] %v1498_v4  ;;  %1571 = vmatmul.f32.vlgmr.msrb.gmra.mxu2 %v1498_v4  ;;  %1591 = vmatmul.f32.vlgmr.msrb.gmra.mxu3 %v1498_v4 }
 0x992   :  { %v1592_v18 = vpop.f32.mrf.mxu3  ;;  %v1572_v11 = vpop.f32.mrf.mxu2 }
 0x993   :  { %1606 = vmatpush.msra.mxu0 %v1592_v18  ;;  %1789 = vmatpush.msra.mxu2 %v1592_v18 }
 0x995   :  { %1607 = vmatpush.msra.mxu0 %v1498_v4  ;;  %1790 = vmatpush.msra.mxu2 %v1498_v4 }
 0x997   :  { %1608 = vmatpush.msra.mxu0 %v1572_v11  ;;  %1791 = vmatpush.msra.mxu2 %v1572_v11 }
 0x999   :  { %1609 = vmatpush.msra.mxu0 %v3207_v57  ;;  %1792 = vmatpush.msra.mxu2 %v3207_v57 }
 0x99b   :  { %1610 = vmatpush.msra.mxu0 %v1552_v21  ;;  %1793 = vmatpush.msra.mxu2 %v1552_v21 }
 0x99c   :  { %1780 = vmatmul.msk.f32.vlgmr.msra.gmra.mxu0 %vm141_vm0, %v2793_v10  ;;  %1783 = vmatmul.msk.f32.vlgmr.msra.gmra.mxu2 %vm141_vm0, %v2826_v14 }
 0x9a4   :  { %1781 = vmatmul.msk.f32.gmra.mxu0 %vm141_vm0, %v2804_v8 }
 0x9ac   :  { %1782 = vmatmul.msk.f32.gmra.mxu0 %vm141_vm0, %v2815_v29 }
 0xa19   :  { %v1612_v36 = vpop.f32.mrf.mxu0 }
 0xa1a   :  { %v1613_v39 = vadd.f32 %v1612_v36, %v2311_v46 }
 0xa1c   :  { %v1784_v60 = vmul.f32 -1.442695, %v1613_v39 }
 0xa1e   :  { %1924 = vpow2.f32 %v1784_v60 }
 0xa1f   :  { %v1621_v1 = vpop.f32.mrf.mxu2 }
 0xa20   :  { %v1622_v2 = vadd.f32 %v1621_v1, %v2320_v63 }
 0xa21   :  { %v1615_v38 = vpop.f32.mrf.mxu0 }
 0xa22   :  { %v1616_v10 = vadd.f32 %v1615_v38, %v2314_v50  ;;  %v1787_v14 = vmul.f32 -1.442695, %v1622_v2 }
 0xa24   :  { %v1925_v33 = vpop.eup %1924  ;;  %v1785_v57 = vmul.f32 -1.442695, %v1616_v10 }
 0xa25   :  { %v1636_v25 = vadd.f32 1.0, %v1925_v33 }
 0xa26   :  { %1926 = vpow2.f32 %v1785_v57 }
 0xa27   :  { %1928 = vpow2.f32 %v1787_v14  ;;  %vm1645_vm10 = vweird.f32 %v1636_v25  ;;  %v1649_v30 = vand.u32 2147483647, %v1636_v25  ;;  %v1651_v9 = vand.u32 2147483648, %v1636_v25 }
 0xa28   :  { %1930 = vrcp.f32 %v1636_v25 }
 0xa29   :  { %v1618_v8 = vpop.f32.mrf.mxu0  ;;  %v1652_v5 = vor.u32 1.1754944e-38, %v1651_v9  ;;  %vm1650_vm2 = vcmp.eq.f32.partialorder %v1649_v30, 8.507059e+37 }
 0xa2a   :  { %v1619_v29 = vadd.f32 %v1618_v8, %v2317_v56 }
 0xa2c   :  { %v1927_v12 = vpop.eup %1926  ;;  %v1786_v46 = vmul.f32 -1.442695, %v1619_v29 }
 0xa2d   :  { %v1637_v53 = vadd.f32 1.0, %v1927_v12  ;;  %v1929_v17 = vpop.eup %1928 }
 0xa2e   :  { %1932 = vpow2.f32 %v1786_v46  ;;  %v1931_v63 = vpop.eup %1930  ;;  %v1639_v58 = vadd.f32 1.0, %v1929_v17 }
 0xa2f   :  { %1934 = vrcp.f32 %v1637_v53  ;;  %v1641_v50 = vmul.f32 %v1931_v63, %v1636_v25  ;;  %vm1646_vm8 = vweird.f32 %v1931_v63  ;;  %v1666_v3 = vand.u32 2147483648, %v1637_v53 }
 0xa30   :  { %1936 = vrcp.f32 %v1639_v58  ;;  %vm1660_vm9 = vweird.f32 %v1637_v53  ;;  %v1664_v40 = vand.u32 2147483647, %v1637_v53  ;;  %vm1647_vm13 = vmor %vm1645_vm10, %vm1646_vm8  ;;  %v1696_v62 = vand.u32 2147483648, %v1639_v58 }
 0xa31   :  { %v1642_v24 = vsub.f32 1.0, %v1641_v50  ;;  %v1667_v28 = vor.u32 1.1754944e-38, %v1666_v3  ;;  %vm1690_vm5 = vweird.f32 %v1639_v58  ;;  %v1694_v4 = vand.u32 2147483647, %v1639_v58 }
 0xa32   :  { %vm1665_vm14 = vcmp.eq.f32.partialorder %v1664_v40, 8.507059e+37  ;;  %v1697_v11 = vor.u32 1.1754944e-38, %v1696_v62 }
 0xa33   :  { %v1643_v13 = vmul.f32 %v1931_v63, %v1642_v24  ;;  %vm1695_vm7 = vcmp.eq.f32.partialorder %v1694_v4, 8.507059e+37 }
 0xa34   :  { %v1933_v52 = vpop.eup %1932 }
 0xa35   :  { %v1638_v54 = vadd.f32 1.0, %v1933_v52  ;;  %v1935_v6 = vpop.eup %1934  ;;  %v1644_v41 = vadd.f32 %v1931_v63, %v1643_v13 }
 0xa36   :  { %v1656_v16 = vmul.f32 %v1935_v6, %v1637_v53  ;;  %v1937_v56 = vpop.eup %1936  ;;  %vm1661_vm0 = vweird.f32 %v1935_v6 }
 0xa37   :  { %1938 = vrcp.f32 %v1638_v54  ;;  %v1686_v42 = vmul.f32 %v1937_v56, %v1639_v58  ;;  %vm1662_vm11 = vmor %vm1660_vm9, %vm1661_vm0  ;;  %v1681_v49 = vand.u32 2147483648, %v1638_v54  ;;  %v1679_v26 = vand.u32 2147483647, %v1638_v54 }
 0xa38   :  { %v1657_v45 = vsub.f32 1.0, %v1656_v16  ;;  %v1648_v15 = vsel %vm1647_vm13, %v1931_v63, %v1644_v41  ;;  %vm1675_vm15 = vweird.f32 %v1638_v54  ;;  %vm1691_vm4 = vweird.f32 %v1937_v56 }
 0xa39   :  { %v1687_v19 = vsub.f32 1.0, %v1686_v42  ;;  %v1682_v22 = vor.u32 1.1754944e-38, %v1681_v49  ;;  %vm1680_vm3 = vcmp.eq.f32.partialorder %v1679_v26, 8.507059e+37  ;;  %v1653_v7 = vsel %vm1650_vm2, %v1652_v5, %v1648_v15  ;;  %vm1692_vm6 = vmor %vm1690_vm5, %vm1691_vm4 }
 0xa3a   :  { %v1658_v32 = vmul.f32 %v1935_v6, %v1657_v45 }
 0xa3b   :  { %v1688_v51 = vmul.f32 %v1937_v56, %v1687_v19 }
 0xa3c   :  { %v1659_v27 = vadd.f32 %v1935_v6, %v1658_v32 }
 0xa3d   :  { %v1939_v55 = vpop.eup %1938  ;;  %v1689_v59 = vadd.f32 %v1937_v56, %v1688_v51 }
 0xa3e   :  { %v1671_v35 = vmul.f32 %v1939_v55, %v1638_v54  ;;  %v1663_v48 = vsel %vm1662_vm11, %v1935_v6, %v1659_v27  ;;  %vm1676_vm12 = vweird.f32 %v1939_v55 }
 0xa3f   :  { %v1668_v31 = vsel %vm1665_vm14, %v1667_v28, %v1663_v48  ;;  %vm1677_vm1 = vmor %vm1675_vm15, %vm1676_vm12  ;;  %v1693_v18 = vsel %vm1692_vm6, %v1937_v56, %v1689_v59 }
 0xa40   :  { %v1672_v43 = vsub.f32 1.0, %v1671_v35  ;;  %v1701_v44 = vmul.f32 %v1668_v31, %v1653_v7  ;;  %v1698_v36 = vsel %vm1695_vm7, %v1697_v11, %v1693_v18 }
 0xa42   :  { %v1673_v61 = vmul.f32 %v1939_v55, %v1672_v43 }
 0xa44   :  { %v1674_v20 = vadd.f32 %v1939_v55, %v1673_v61 }
 0xa46   :  { %v1678_v34 = vsel %vm1677_vm1, %v1939_v55, %v1674_v20 }
 0xa47   :  { %v1683_v23 = vsel %vm1680_vm3, %v1682_v22, %v1678_v34 }
 0xa48   :  { %v1700_v37 = vmul.f32 %v1683_v23, %v3218_v0 }
 0xa4a   :  { %v1702_v47 = vadd.f32 %v1701_v44, %v1700_v37 }
 0xa4c   :  { %1940 = vtanh.f32 %v1702_v47 }
 0xa52   :  { %v1941_v21 = vpop.eup %1940 }
 0xa53   :  { %v1704_v39 = vmul.f32 %v1941_v21, %v1698_v36 }
 0xa55   :  { %1788 = vst [vmem:[%s3248_s5 + $0x38] sm:$0xff] %v1704_v39 }

</bundles_post_ra>
